<compile_context>
chip_gen: v6e
topology: v6e:2x2x1
jax: 0.10.0
libtpu: 0.0.40
codegen_flags: <defaults>
</compile_context>

<pallas_src>
import functools

import jax
import jax.numpy as jnp
from jax import lax
from jax.experimental import pallas as pl
from jax.experimental.pallas import tpu as pltpu

_GRAY_W = (0.2989, 0.587, 0.114)  # torchvision rgb_to_grayscale weights
_LANES = 128


def _frac(x):
    # Fractional part with a guard so rounding never returns exactly 1.0.
    f = x - jnp.floor(x)
    return jnp.where(f >= 1.0, f - 1.0, f)


def _gray(r, g, b):
    return _GRAY_W[0] * r + _GRAY_W[1] * g + _GRAY_W[2] * b


def _adjust_hue(r, g, b, hue_factor):
    # Mirrors torchvision _rgb2hsv / _hsv2rgb float tensor path on dense (R, 128) tiles.
    maxc = jnp.maximum(jnp.maximum(r, g), b)
    minc = jnp.minimum(jnp.minimum(r, g), b)
    eqc = maxc == minc
    cr = maxc - minc
    ones = jnp.ones_like(maxc)

    # EUP approximate reciprocals (free slot); one Newton step on 1/cr because the
    # division result feeds exact sextant selection (review correctness concern).
    inv_max = pl.reciprocal(jnp.where(eqc, ones, maxc), approx=True)
    cr_safe = jnp.where(eqc, ones, cr)
    inv_cr = pl.reciprocal(cr_safe, approx=True)
    inv_cr = inv_cr * (2.0 - cr_safe * inv_cr)

    s = cr * inv_max
    rc = (maxc - r) * inv_cr
    gc = (maxc - g) * inv_cr
    bc = (maxc - b) * inv_cr
    is_r = maxc == r
    is_g = (maxc == g) & (~is_r)
    is_b = (~is_g) & (~is_r)
    h = (jnp.where(is_r, bc - gc, 0.0)
         + jnp.where(is_g, 2.0 + rc - bc, 0.0)
         + jnp.where(is_b, 4.0 + gc - rc, 0.0))
    h = _frac(h * (1.0 / 6.0) + 1.0)

    # hue shift
    h = _frac(h + hue_factor)
    v = maxc

    # hsv -> rgb
    h6 = h * 6.0
    i = jnp.floor(h6)
    f = h6 - i
    i = jnp.where(i >= 6.0, i - 6.0, i)
    # Clamps match torchvision's _hsv2rgb and absorb approx-reciprocal overshoot.
    p = jnp.clip(v * (1.0 - s), 0.0, 1.0)
    q = jnp.clip(v * (1.0 - s * f), 0.0, 1.0)
    t = jnp.clip(v * (1.0 - s * (1.0 - f)), 0.0, 1.0)

    # Hoisted sextant masks, reused across the three channel selects.
    m0 = i == 0.0
    m1 = i == 1.0
    m2 = i == 2.0
    m3 = i == 3.0
    m4 = i == 4.0

    def sel(a0, a1, a2, a3, a4, a5):
        out = a5
        out = jnp.where(m4, a4, out)
        out = jnp.where(m3, a3, out)
        out = jnp.where(m2, a2, out)
        out = jnp.where(m1, a1, out)
        out = jnp.where(m0, a0, out)
        return out

    # NOTE(v5e): if the single vector-store slot binds, fuse these where-chains further /
    # drop intermediates -- re-derive from a bundle dump on hardware.
    r_out = sel(v, q, p, p, t, v)
    g_out = sel(t, v, v, q, p, p)
    b_out = sel(p, p, t, v, v, q)
    return r_out, g_out, b_out


def _color_jitter_kernel(fn_idx_ref, fac_ref, img_ref, out_ref, *, true_pixels):
    # fn_idx_ref: (4, n_imgs_padded) int32 SMEM  -- per-image op order (long axis last)
    # fac_ref:    (4, n_imgs_padded) float32 SMEM -- rows = [brightness, contrast, sat, hue]
    # img_ref / out_ref: (imgs_per_step, 3, R, 128) VMEM tiles (sublane+lane dense)
    g_idx = pl.program_id(0)
    imgs_per_step = img_ref.shape[0]
    inv_np = 1.0 / float(true_pixels)

    def body(k, carry):
        row = g_idx * imgs_per_step + k

        r = img_ref[k, 0, :, :].astype(jnp.float32)
        g = img_ref[k, 1, :, :].astype(jnp.float32)
        b = img_ref[k, 2, :, :].astype(jnp.float32)

        bf = fac_ref[0, row]
        cf = fac_ref[1, row]
        sf = fac_ref[2, row]
        hf = fac_ref[3, row]

        def brightness(rgb):
            r_, g_, b_ = rgb
            return (jnp.clip(r_ * bf, 0.0, 1.0),
                    jnp.clip(g_ * bf, 0.0, 1.0),
                    jnp.clip(b_ * bf, 0.0, 1.0))

        def contrast(rgb):
            r_, g_, b_ = rgb
            gray = _gray(r_, g_, b_)
            # Spatial padding is exactly 0 when contrast runs (brightness / saturation /
            # hue all map 0 -> 0), so sum / true_pixels equals torchvision's mean.
            mean = jnp.sum(gray) * inv_np
            off = (1.0 - cf) * mean
            return (jnp.clip(cf * r_ + off, 0.0, 1.0),
                    jnp.clip(cf * g_ + off, 0.0, 1.0),
                    jnp.clip(cf * b_ + off, 0.0, 1.0))

        def saturation(rgb):
            r_, g_, b_ = rgb
            gray = (1.0 - sf) * _gray(r_, g_, b_)
            return (jnp.clip(sf * r_ + gray, 0.0, 1.0),
                    jnp.clip(sf * g_ + gray, 0.0, 1.0),
                    jnp.clip(sf * b_ + gray, 0.0, 1.0))

        def hue(rgb):
            r_, g_, b_ = rgb
            return _adjust_hue(r_, g_, b_, hf)

        branches = (brightness, contrast, saturation, hue)
        rgb = (r, g, b)
        # 4 fixed positions; the op at each position is chosen by an SMEM scalar, so only
        # the selected op runs (scalar-driven lax.switch).
        for step in range(4):
            fid = fn_idx_ref[step, row]
            rgb = lax.switch(fid, branches, rgb)

        r_out, g_out, b_out = rgb
        out_ref[k, 0, :, :] = r_out.astype(out_ref.dtype)
        out_ref[k, 1, :, :] = g_out.astype(out_ref.dtype)
        out_ref[k, 2, :, :] = b_out.astype(out_ref.dtype)
        return carry

    lax.fori_loop(0, imgs_per_step, body, 0)


def _choose_imgs_per_step(n_imgs, img_bytes, max_tile_bytes=2 << 20, target_steps=8):
    """Images coalesced per grid step: bounded by ~2 MiB tiles, and capped so the
    'parallel' grid axis keeps >= 2 (target ~8) steps for megacore + pipelining."""
    by_bytes = max(1, int(max_tile_bytes // max(1, img_bytes)))
    by_steps = max(1, n_imgs // target_steps)
    if n_imgs >= 2:
        by_steps = min(by_steps, n_imgs // 2)   # never fewer than 2 grid steps
    return max(1, min(by_bytes, by_steps))


def color_jitter_batch(images, fn_idx, factors):
    """images: (B, N, 3, H, W) float in [0,1]; fn_idx/factors: (4, B*N) int32/float32."""
    B, N, C, H, W = images.shape
    assert C == 3
    n_imgs = B * N
    P = H * W

    # Sublane+lane dense layout: flatten spatial dims, pad to a multiple of 128 lanes,
    # and fold into (R, 128) per channel so vregs are (nearly) fully populated.
    L = _LANES
    P_pad = ((P + L - 1) // L) * L
    R = P_pad // L

    x = images.reshape(n_imgs, C, P)
    if P_pad != P:
        x = jnp.pad(x, ((0, 0), (0, 0), (0, P_pad - P)))

    img_bytes = C * P_pad * x.dtype.itemsize
    imgs = _choose_imgs_per_step(n_imgs, img_bytes)
    # TODO(synk): for very large images (per-image bytes approaching the VMEM budget,
    # esp. v7x's 64 MiB) tile the spatial dim (inner pltpu.emit_pipeline / P-chunk loop)
    # and feed pre-computed per-image gray means via scalar prefetch.

    # Pad the image count so awkward/prime B*N doesn't degrade the tile size.
    n_pad_imgs = ((n_imgs + imgs - 1) // imgs) * imgs
    fn_idx = fn_idx.astype(jnp.int32)
    factors = factors.astype(jnp.float32)
    if n_pad_imgs != n_imgs:
        pad = n_pad_imgs - n_imgs
        x = jnp.pad(x, ((0, pad), (0, 0), (0, 0)))
        fn_idx = jnp.pad(fn_idx, ((0, 0), (0, pad)))
        factors = jnp.pad(factors, ((0, 0), (0, pad)))
    x = x.reshape(n_pad_imgs, C, R, L)
    n_steps = n_pad_imgs // imgs

    # Deliberate VMEM budget: 2x-in + 2x-out double buffers plus per-image f32 hue
    # temporaries, instead of relying on the 16/32 MiB scoped defaults.
    tile_bytes = imgs * C * P_pad * x.dtype.itemsize
    chan_bytes = P_pad * 4
    vmem_limit = int(min(max(4 * tile_bytes + 32 * chan_bytes + (2 << 20), 16 << 20),
                         48 << 20))

    grid_spec = pltpu.PrefetchScalarGridSpec(
        num_scalar_prefetch=2,
        grid=(n_steps,),
        in_specs=[pl.BlockSpec((imgs, C, R, L), lambda g, *_: (g, 0, 0, 0))],
        out_specs=pl.BlockSpec((imgs, C, R, L), lambda g, *_: (g, 0, 0, 0)),
    )
    kernel = functools.partial(_color_jitter_kernel, true_pixels=P)
    out = pl.pallas_call(
        kernel,
        out_shape=jax.ShapeDtypeStruct(x.shape, x.dtype),
        grid_spec=grid_spec,
        compiler_params=pltpu.CompilerParams(
            dimension_semantics=("parallel",),
            vmem_limit_bytes=vmem_limit),
    )(fn_idx, factors, x)

    out = out.reshape(n_pad_imgs, C, P_pad)[:n_imgs, :, :P]
    return out.reshape(images.shape)


def sample_color_jitter_params(key, batch_size, n_inner, individually=False,
                               brightness=(0.8, 1.2), contrast=(0.8, 1.2),
                               saturation=(0.8, 1.2), hue=(-0.1, 0.1)):
    """Plain-JAX equivalent of ColorJitter.get_params, per batch element
    (or per image if individually=True). Returns (4, B*N) tables (long axis last)."""
    n = batch_size * n_inner if individually else batch_size
    k_perm, k_b, k_c, k_s, k_h = jax.random.split(key, 5)
    perm_keys = jax.random.split(k_perm, n)
    fn_idx = jnp.stack(
        [jax.random.permutation(k, 4) for k in perm_keys]).astype(jnp.int32)  # (n, 4)
    bf = jax.random.uniform(k_b, (n,), minval=brightness[0], maxval=brightness[1])
    cf = jax.random.uniform(k_c, (n,), minval=contrast[0], maxval=contrast[1])
    sf = jax.random.uniform(k_s, (n,), minval=saturation[0], maxval=saturation[1])
    hf = jax.random.uniform(k_h, (n,), minval=hue[0], maxval=hue[1])
    factors = jnp.stack([bf, cf, sf, hf], axis=0).astype(jnp.float32)  # (4, n)
    fn_idx = fn_idx.T  # (4, n)
    if not individually:
        # same params for all N images of a batch element (module default)
        fn_idx = jnp.repeat(fn_idx, n_inner, axis=1)
        factors = jnp.repeat(factors, n_inner, axis=1)
    return fn_idx, factors


if __name__ == "__main__":
    key = jax.random.PRNGKey(0)
    k_img, k_par = jax.random.split(key)

    B, N, C, H, W = 2, 2, 3, 16, 16  # B batch elems, N images each (sample['image'][b][i])
    images = jax.random.uniform(k_img, (B, N, C, H, W), dtype=jnp.float32)

    fn_idx, factors = sample_color_jitter_params(k_par, B, N, individually=False)

    out = color_jitter_batch(images, fn_idx, factors)
    jax.block_until_ready(out)

    assert out.shape == images.shape and out.dtype == images.dtype
    assert bool(jnp.all(jnp.isfinite(out)))
    assert bool(jnp.all((out >= 0.0) & (out <= 1.0)))
    print("KERNEL_OK")
</pallas_src>

<mosaic_0001>
module attributes {stable_mosaic.version = 11 : i64} {
  func.func @_color_jitter_kernel(%arg0: i32, %arg1: memref<4x4xi32, #tpu.memory_space<smem>>, %arg2: memref<4x4xf32, #tpu.memory_space<smem>>, %arg3: memref<1x3x2x128xf32, #tpu.memory_space<vmem>>, %arg4: memref<1x3x2x128xf32, #tpu.memory_space<vmem>>) attributes {dimension_semantics = [#tpu.dimension_semantics<parallel>], iteration_bounds = array<i64: 4>, scalar_prefetch = 2 : i64, scratch_operands = 0 : i64, tpu.core_type = #tpu.core_type<tc>, window_params = [{transform_indices = @transform_0, window_bounds = array<i64: 1, 3, 2, 128>}, {transform_indices = @transform_1, window_bounds = array<i64: 1, 3, 2, 128>}]} {
    %c0_i32 = arith.constant 0 : i32
    %c1_i32 = arith.constant 1 : i32
    %0 = arith.muli %arg0, %c1_i32 : i32
    %1 = arith.addi %0, %c0_i32 : i32
    %2 = arith.index_cast %c0_i32 : i32 to index
    %c0 = arith.constant 0 : index
    %c0_0 = arith.constant 0 : index
    %c0_1 = arith.constant 0 : index
    %3 = vector.load %arg3[%2, %c0, %c0_0, %c0_1] : memref<1x3x2x128xf32, #tpu.memory_space<vmem>>, vector<1x1x2x128xf32>
    %4 = vector.shape_cast %3 : vector<1x1x2x128xf32> to vector<2x128xf32>
    %5 = arith.index_cast %c0_i32 : i32 to index
    %c1 = arith.constant 1 : index
    %c0_2 = arith.constant 0 : index
    %c0_3 = arith.constant 0 : index
    %6 = vector.load %arg3[%5, %c1, %c0_2, %c0_3] : memref<1x3x2x128xf32, #tpu.memory_space<vmem>>, vector<1x1x2x128xf32>
    %7 = vector.shape_cast %6 : vector<1x1x2x128xf32> to vector<2x128xf32>
    %8 = arith.index_cast %c0_i32 : i32 to index
    %c2 = arith.constant 2 : index
    %c0_4 = arith.constant 0 : index
    %c0_5 = arith.constant 0 : index
    %9 = vector.load %arg3[%8, %c2, %c0_4, %c0_5] : memref<1x3x2x128xf32, #tpu.memory_space<vmem>>, vector<1x1x2x128xf32>
    %10 = vector.shape_cast %9 : vector<1x1x2x128xf32> to vector<2x128xf32>
    %c0_6 = arith.constant 0 : index
    %11 = arith.index_cast %1 : i32 to index
    %12 = memref.load %arg2[%c0_6, %11] : memref<4x4xf32, #tpu.memory_space<smem>>
    %c1_7 = arith.constant 1 : index
    %13 = arith.index_cast %1 : i32 to index
    %14 = memref.load %arg2[%c1_7, %13] : memref<4x4xf32, #tpu.memory_space<smem>>
    %c2_8 = arith.constant 2 : index
    %15 = arith.index_cast %1 : i32 to index
    %16 = memref.load %arg2[%c2_8, %15] : memref<4x4xf32, #tpu.memory_space<smem>>
    %c3 = arith.constant 3 : index
    %17 = arith.index_cast %1 : i32 to index
    %18 = memref.load %arg2[%c3, %17] : memref<4x4xf32, #tpu.memory_space<smem>>
    %c0_9 = arith.constant 0 : index
    %19 = arith.index_cast %1 : i32 to index
    %20 = memref.load %arg1[%c0_9, %19] : memref<4x4xi32, #tpu.memory_space<smem>>
    %c0_i32_10 = arith.constant 0 : i32
    %c3_i32 = arith.constant 3 : i32
    %21 = arith.maxsi %20, %c0_i32_10 : i32
    %22 = arith.minsi %21, %c3_i32 : i32
    %c0_i32_11 = arith.constant 0 : i32
    %23 = arith.cmpi ne, %22, %c0_i32_11 : i32
    %24:3 = scf.if %23 -> (vector<2x128xf32>, vector<2x128xf32>, vector<2x128xf32>) {
      %c1_i32_34 = arith.constant 1 : i32
      %55 = arith.subi %22, %c1_i32_34 : i32
      %c0_i32_35 = arith.constant 0 : i32
      %56 = arith.cmpi ne, %55, %c0_i32_35 : i32
      %57:3 = scf.if %56 -> (vector<2x128xf32>, vector<2x128xf32>, vector<2x128xf32>) {
        %c1_i32_36 = arith.constant 1 : i32
        %58 = arith.subi %55, %c1_i32_36 : i32
        %c0_i32_37 = arith.constant 0 : i32
        %59 = arith.cmpi ne, %58, %c0_i32_37 : i32
        %60:3 = scf.if %59 -> (vector<2x128xf32>, vector<2x128xf32>, vector<2x128xf32>) {
          %61 = arith.maximumf %4, %7 : vector<2x128xf32>
          %62 = arith.maximumf %61, %10 : vector<2x128xf32>
          %63 = arith.minimumf %4, %7 : vector<2x128xf32>
          %64 = arith.minimumf %63, %10 : vector<2x128xf32>
          %65 = arith.cmpf oeq, %62, %64 : vector<2x128xf32>
          %66 = arith.subf %62, %64 : vector<2x128xf32>
          %cst = arith.constant 1.000000e+00 : f32
          %67 = vector.broadcast %cst : f32 to vector<2x128xf32>
          %68 = arith.select %65, %67, %62 : vector<2x128xi1>, vector<2x128xf32>
          %69 = tpu.reciprocal %68 {approx = true} : vector<2x128xf32> -> vector<2x128xf32>
          %70 = arith.select %65, %67, %66 : vector<2x128xi1>, vector<2x128xf32>
          %71 = tpu.reciprocal %70 {approx = true} : vector<2x128xf32> -> vector<2x128xf32>
          %72 = arith.mulf %70, %71 : vector<2x128xf32>
          %cst_38 = arith.constant 2.000000e+00 : f32
          %73 = vector.broadcast %cst_38 : f32 to vector<2x128xf32>
          %74 = arith.subf %73, %72 : vector<2x128xf32>
          %75 = arith.mulf %71, %74 : vector<2x128xf32>
          %76 = arith.mulf %66, %69 : vector<2x128xf32>
          %77 = arith.subf %62, %4 : vector<2x128xf32>
          %78 = arith.mulf %77, %75 : vector<2x128xf32>
          %79 = arith.subf %62, %7 : vector<2x128xf32>
          %80 = arith.mulf %79, %75 : vector<2x128xf32>
          %81 = arith.subf %62, %10 : vector<2x128xf32>
          %82 = arith.mulf %81, %75 : vector<2x128xf32>
          %83 = arith.cmpf oeq, %62, %4 : vector<2x128xf32>
          %84 = arith.cmpf oeq, %62, %7 : vector<2x128xf32>
          %cst_39 = arith.constant dense<true> : vector<2x128xi1>
          %85 = arith.xori %83, %cst_39 : vector<2x128xi1>
          %86 = arith.andi %84, %85 : vector<2x128xi1>
          %cst_40 = arith.constant dense<true> : vector<2x128xi1>
          %87 = arith.xori %86, %cst_40 : vector<2x128xi1>
          %cst_41 = arith.constant dense<true> : vector<2x128xi1>
          %88 = arith.xori %83, %cst_41 : vector<2x128xi1>
          %89 = arith.andi %87, %88 : vector<2x128xi1>
          %90 = arith.subf %82, %80 : vector<2x128xf32>
          %cst_42 = arith.constant 0.000000e+00 : f32
          %91 = vector.broadcast %cst_42 : f32 to vector<2x128xf32>
          %92 = arith.select %83, %90, %91 : vector<2x128xi1>, vector<2x128xf32>
          %cst_43 = arith.constant 2.000000e+00 : f32
          %93 = vector.broadcast %cst_43 : f32 to vector<2x128xf32>
          %94 = arith.addf %93, %78 : vector<2x128xf32>
          %95 = arith.subf %94, %82 : vector<2x128xf32>
          %cst_44 = arith.constant 0.000000e+00 : f32
          %96 = vector.broadcast %cst_44 : f32 to vector<2x128xf32>
          %97 = arith.select %86, %95, %96 : vector<2x128xi1>, vector<2x128xf32>
          %98 = arith.addf %92, %97 : vector<2x128xf32>
          %cst_45 = arith.constant 4.000000e+00 : f32
          %99 = vector.broadcast %cst_45 : f32 to vector<2x128xf32>
          %100 = arith.addf %99, %80 : vector<2x128xf32>
          %101 = arith.subf %100, %78 : vector<2x128xf32>
          %cst_46 = arith.constant 0.000000e+00 : f32
          %102 = vector.broadcast %cst_46 : f32 to vector<2x128xf32>
          %103 = arith.select %89, %101, %102 : vector<2x128xi1>, vector<2x128xf32>
          %104 = arith.addf %98, %103 : vector<2x128xf32>
          %cst_47 = arith.constant 0.166666672 : f32
          %105 = vector.broadcast %cst_47 : f32 to vector<2x128xf32>
          %106 = arith.mulf %104, %105 : vector<2x128xf32>
          %cst_48 = arith.constant 1.000000e+00 : f32
          %107 = vector.broadcast %cst_48 : f32 to vector<2x128xf32>
          %108 = arith.addf %106, %107 : vector<2x128xf32>
          %109 = math.floor %108 : vector<2x128xf32>
          %110 = arith.subf %108, %109 : vector<2x128xf32>
          %cst_49 = arith.constant 1.000000e+00 : f32
          %111 = vector.broadcast %cst_49 : f32 to vector<2x128xf32>
          %112 = arith.cmpf oge, %110, %111 : vector<2x128xf32>
          %cst_50 = arith.constant 1.000000e+00 : f32
          %113 = vector.broadcast %cst_50 : f32 to vector<2x128xf32>
          %114 = arith.subf %110, %113 : vector<2x128xf32>
          %115 = arith.select %112, %114, %110 : vector<2x128xi1>, vector<2x128xf32>
          %116 = vector.broadcast %18 : f32 to vector<2x128xf32>
          %117 = arith.addf %115, %116 : vector<2x128xf32>
          %118 = math.floor %117 : vector<2x128xf32>
          %119 = arith.subf %117, %118 : vector<2x128xf32>
          %cst_51 = arith.constant 1.000000e+00 : f32
          %120 = vector.broadcast %cst_51 : f32 to vector<2x128xf32>
          %121 = arith.cmpf oge, %119, %120 : vector<2x128xf32>
          %cst_52 = arith.constant 1.000000e+00 : f32
          %122 = vector.broadcast %cst_52 : f32 to vector<2x128xf32>
          %123 = arith.subf %119, %122 : vector<2x128xf32>
          %124 = arith.select %121, %123, %119 : vector<2x128xi1>, vector<2x128xf32>
          %cst_53 = arith.constant 6.000000e+00 : f32
          %125 = vector.broadcast %cst_53 : f32 to vector<2x128xf32>
          %126 = arith.mulf %124, %125 : vector<2x128xf32>
          %127 = math.floor %126 : vector<2x128xf32>
          %128 = arith.subf %126, %127 : vector<2x128xf32>
          %cst_54 = arith.constant 6.000000e+00 : f32
          %129 = vector.broadcast %cst_54 : f32 to vector<2x128xf32>
          %130 = arith.cmpf oge, %127, %129 : vector<2x128xf32>
          %cst_55 = arith.constant 6.000000e+00 : f32
          %131 = vector.broadcast %cst_55 : f32 to vector<2x128xf32>
          %132 = arith.subf %127, %131 : vector<2x128xf32>
          %133 = arith.select %130, %132, %127 : vector<2x128xi1>, vector<2x128xf32>
          %cst_56 = arith.constant 1.000000e+00 : f32
          %134 = vector.broadcast %cst_56 : f32 to vector<2x128xf32>
          %135 = arith.subf %134, %76 : vector<2x128xf32>
          %136 = arith.mulf %62, %135 : vector<2x128xf32>
          %cst_57 = arith.constant 0.000000e+00 : f32
          %cst_58 = arith.constant 1.000000e+00 : f32
          %137 = vector.broadcast %cst_57 : f32 to vector<2x128xf32>
          %138 = arith.maximumf %137, %136 : vector<2x128xf32>
          %139 = vector.broadcast %cst_58 : f32 to vector<2x128xf32>
          %140 = arith.minimumf %139, %138 : vector<2x128xf32>
          %141 = arith.mulf %76, %128 : vector<2x128xf32>
          %cst_59 = arith.constant 1.000000e+00 : f32
          %142 = vector.broadcast %cst_59 : f32 to vector<2x128xf32>
          %143 = arith.subf %142, %141 : vector<2x128xf32>
          %144 = arith.mulf %62, %143 : vector<2x128xf32>
          %cst_60 = arith.constant 0.000000e+00 : f32
          %cst_61 = arith.constant 1.000000e+00 : f32
          %145 = vector.broadcast %cst_60 : f32 to vector<2x128xf32>
          %146 = arith.maximumf %145, %144 : vector<2x128xf32>
          %147 = vector.broadcast %cst_61 : f32 to vector<2x128xf32>
          %148 = arith.minimumf %147, %146 : vector<2x128xf32>
          %cst_62 = arith.constant 1.000000e+00 : f32
          %149 = vector.broadcast %cst_62 : f32 to vector<2x128xf32>
          %150 = arith.subf %149, %128 : vector<2x128xf32>
          %151 = arith.mulf %76, %150 : vector<2x128xf32>
          %cst_63 = arith.constant 1.000000e+00 : f32
          %152 = vector.broadcast %cst_63 : f32 to vector<2x128xf32>
          %153 = arith.subf %152, %151 : vector<2x128xf32>
          %154 = arith.mulf %62, %153 : vector<2x128xf32>
          %cst_64 = arith.constant 0.000000e+00 : f32
          %cst_65 = arith.constant 1.000000e+00 : f32
          %155 = vector.broadcast %cst_64 : f32 to vector<2x128xf32>
          %156 = arith.maximumf %155, %154 : vector<2x128xf32>
          %157 = vector.broadcast %cst_65 : f32 to vector<2x128xf32>
          %158 = arith.minimumf %157, %156 : vector<2x128xf32>
          %cst_66 = arith.constant 0.000000e+00 : f32
          %159 = vector.broadcast %cst_66 : f32 to vector<2x128xf32>
          %160 = arith.cmpf oeq, %133, %159 : vector<2x128xf32>
          %cst_67 = arith.constant 1.000000e+00 : f32
          %161 = vector.broadcast %cst_67 : f32 to vector<2x128xf32>
          %162 = arith.cmpf oeq, %133, %161 : vector<2x128xf32>
          %cst_68 = arith.constant 2.000000e+00 : f32
          %163 = vector.broadcast %cst_68 : f32 to vector<2x128xf32>
          %164 = arith.cmpf oeq, %133, %163 : vector<2x128xf32>
          %cst_69 = arith.constant 3.000000e+00 : f32
          %165 = vector.broadcast %cst_69 : f32 to vector<2x128xf32>
          %166 = arith.cmpf oeq, %133, %165 : vector<2x128xf32>
          %cst_70 = arith.constant 4.000000e+00 : f32
          %167 = vector.broadcast %cst_70 : f32 to vector<2x128xf32>
          %168 = arith.cmpf oeq, %133, %167 : vector<2x128xf32>
          %169 = arith.select %168, %158, %62 : vector<2x128xi1>, vector<2x128xf32>
          %170 = arith.select %166, %140, %169 : vector<2x128xi1>, vector<2x128xf32>
          %171 = arith.select %164, %140, %170 : vector<2x128xi1>, vector<2x128xf32>
          %172 = arith.select %162, %148, %171 : vector<2x128xi1>, vector<2x128xf32>
          %173 = arith.select %160, %62, %172 : vector<2x128xi1>, vector<2x128xf32>
          %174 = arith.select %168, %140, %140 : vector<2x128xi1>, vector<2x128xf32>
          %175 = arith.select %166, %148, %174 : vector<2x128xi1>, vector<2x128xf32>
          %176 = arith.select %164, %62, %175 : vector<2x128xi1>, vector<2x128xf32>
          %177 = arith.select %162, %62, %176 : vector<2x128xi1>, vector<2x128xf32>
          %178 = arith.select %160, %158, %177 : vector<2x128xi1>, vector<2x128xf32>
          %179 = arith.select %168, %62, %148 : vector<2x128xi1>, vector<2x128xf32>
          %180 = arith.select %166, %62, %179 : vector<2x128xi1>, vector<2x128xf32>
          %181 = arith.select %164, %158, %180 : vector<2x128xi1>, vector<2x128xf32>
          %182 = arith.select %162, %140, %181 : vector<2x128xi1>, vector<2x128xf32>
          %183 = arith.select %160, %140, %182 : vector<2x128xi1>, vector<2x128xf32>
          scf.yield %173, %178, %183 : vector<2x128xf32>, vector<2x128xf32>, vector<2x128xf32>
        } else {
          %cst = arith.constant 1.000000e+00 : f32
          %61 = arith.subf %cst, %16 : f32
          %cst_38 = arith.constant 2.989000e-01 : f32
          %62 = vector.broadcast %cst_38 : f32 to vector<2x128xf32>
          %63 = arith.mulf %62, %4 : vector<2x128xf32>
          %cst_39 = arith.constant 5.870000e-01 : f32
          %64 = vector.broadcast %cst_39 : f32 to vector<2x128xf32>
          %65 = arith.mulf %64, %7 : vector<2x128xf32>
          %66 = arith.addf %63, %65 : vector<2x128xf32>
          %cst_40 = arith.constant 1.140000e-01 : f32
          %67 = vector.broadcast %cst_40 : f32 to vector<2x128xf32>
          %68 = arith.mulf %67, %10 : vector<2x128xf32>
          %69 = arith.addf %66, %68 : vector<2x128xf32>
          %70 = vector.broadcast %61 : f32 to vector<2x128xf32>
          %71 = arith.mulf %70, %69 : vector<2x128xf32>
          %72 = vector.broadcast %16 : f32 to vector<2x128xf32>
          %73 = arith.mulf %72, %4 : vector<2x128xf32>
          %74 = arith.addf %73, %71 : vector<2x128xf32>
          %cst_41 = arith.constant 0.000000e+00 : f32
          %cst_42 = arith.constant 1.000000e+00 : f32
          %75 = vector.broadcast %cst_41 : f32 to vector<2x128xf32>
          %76 = arith.maximumf %75, %74 : vector<2x128xf32>
          %77 = vector.broadcast %cst_42 : f32 to vector<2x128xf32>
          %78 = arith.minimumf %77, %76 : vector<2x128xf32>
          %79 = vector.broadcast %16 : f32 to vector<2x128xf32>
          %80 = arith.mulf %79, %7 : vector<2x128xf32>
          %81 = arith.addf %80, %71 : vector<2x128xf32>
          %cst_43 = arith.constant 0.000000e+00 : f32
          %cst_44 = arith.constant 1.000000e+00 : f32
          %82 = vector.broadcast %cst_43 : f32 to vector<2x128xf32>
          %83 = arith.maximumf %82, %81 : vector<2x128xf32>
          %84 = vector.broadcast %cst_44 : f32 to vector<2x128xf32>
          %85 = arith.minimumf %84, %83 : vector<2x128xf32>
          %86 = vector.broadcast %16 : f32 to vector<2x128xf32>
          %87 = arith.mulf %86, %10 : vector<2x128xf32>
          %88 = arith.addf %87, %71 : vector<2x128xf32>
          %cst_45 = arith.constant 0.000000e+00 : f32
          %cst_46 = arith.constant 1.000000e+00 : f32
          %89 = vector.broadcast %cst_45 : f32 to vector<2x128xf32>
          %90 = arith.maximumf %89, %88 : vector<2x128xf32>
          %91 = vector.broadcast %cst_46 : f32 to vector<2x128xf32>
          %92 = arith.minimumf %91, %90 : vector<2x128xf32>
          scf.yield %78, %85, %92 : vector<2x128xf32>, vector<2x128xf32>, vector<2x128xf32>
        }
        scf.yield %60#0, %60#1, %60#2 : vector<2x128xf32>, vector<2x128xf32>, vector<2x128xf32>
      } else {
        %cst = arith.constant 2.989000e-01 : f32
        %58 = vector.broadcast %cst : f32 to vector<2x128xf32>
        %59 = arith.mulf %58, %4 : vector<2x128xf32>
        %cst_36 = arith.constant 5.870000e-01 : f32
        %60 = vector.broadcast %cst_36 : f32 to vector<2x128xf32>
        %61 = arith.mulf %60, %7 : vector<2x128xf32>
        %62 = arith.addf %59, %61 : vector<2x128xf32>
        %cst_37 = arith.constant 1.140000e-01 : f32
        %63 = vector.broadcast %cst_37 : f32 to vector<2x128xf32>
        %64 = arith.mulf %63, %10 : vector<2x128xf32>
        %65 = arith.addf %62, %64 : vector<2x128xf32>
        %66 = vector.shape_cast %65 : vector<2x128xf32> to vector<1x2x128xf32>
        %cst_38 = arith.constant dense<0.000000e+00> : vector<1xf32>
        %67 = vector.multi_reduction <add>, %66, %cst_38 [1, 2] : vector<1x2x128xf32> to vector<1xf32>
        %68 = vector.shape_cast %67 : vector<1xf32> to vector<1x1x1xf32>
        %69 = vector.extract %68[0, 0, 0] : f32 from vector<1x1x1xf32>
        %cst_39 = arith.constant 3.906250e-03 : f32
        %70 = arith.mulf %69, %cst_39 : f32
        %cst_40 = arith.constant 1.000000e+00 : f32
        %71 = arith.subf %cst_40, %14 : f32
        %72 = arith.mulf %71, %70 : f32
        %73 = vector.broadcast %14 : f32 to vector<2x128xf32>
        %74 = arith.mulf %73, %4 : vector<2x128xf32>
        %75 = vector.broadcast %72 : f32 to vector<2x128xf32>
        %76 = arith.addf %74, %75 : vector<2x128xf32>
        %cst_41 = arith.constant 0.000000e+00 : f32
        %cst_42 = arith.constant 1.000000e+00 : f32
        %77 = vector.broadcast %cst_41 : f32 to vector<2x128xf32>
        %78 = arith.maximumf %77, %76 : vector<2x128xf32>
        %79 = vector.broadcast %cst_42 : f32 to vector<2x128xf32>
        %80 = arith.minimumf %79, %78 : vector<2x128xf32>
        %81 = vector.broadcast %14 : f32 to vector<2x128xf32>
        %82 = arith.mulf %81, %7 : vector<2x128xf32>
        %83 = vector.broadcast %72 : f32 to vector<2x128xf32>
        %84 = arith.addf %82, %83 : vector<2x128xf32>
        %cst_43 = arith.constant 0.000000e+00 : f32
        %cst_44 = arith.constant 1.000000e+00 : f32
        %85 = vector.broadcast %cst_43 : f32 to vector<2x128xf32>
        %86 = arith.maximumf %85, %84 : vector<2x128xf32>
        %87 = vector.broadcast %cst_44 : f32 to vector<2x128xf32>
        %88 = arith.minimumf %87, %86 : vector<2x128xf32>
        %89 = vector.broadcast %14 : f32 to vector<2x128xf32>
        %90 = arith.mulf %89, %10 : vector<2x128xf32>
        %91 = vector.broadcast %72 : f32 to vector<2x128xf32>
        %92 = arith.addf %90, %91 : vector<2x128xf32>
        %cst_45 = arith.constant 0.000000e+00 : f32
        %cst_46 = arith.constant 1.000000e+00 : f32
        %93 = vector.broadcast %cst_45 : f32 to vector<2x128xf32>
        %94 = arith.maximumf %93, %92 : vector<2x128xf32>
        %95 = vector.broadcast %cst_46 : f32 to vector<2x128xf32>
        %96 = arith.minimumf %95, %94 : vector<2x128xf32>
        scf.yield %80, %88, %96 : vector<2x128xf32>, vector<2x128xf32>, vector<2x128xf32>
      }
      scf.yield %57#0, %57#1, %57#2 : vector<2x128xf32>, vector<2x128xf32>, vector<2x128xf32>
    } else {
      %55 = vector.broadcast %12 : f32 to vector<2x128xf32>
      %56 = arith.mulf %4, %55 : vector<2x128xf32>
      %cst = arith.constant 0.000000e+00 : f32
      %cst_34 = arith.constant 1.000000e+00 : f32
      %57 = vector.broadcast %cst : f32 to vector<2x128xf32>
      %58 = arith.maximumf %57, %56 : vector<2x128xf32>
      %59 = vector.broadcast %cst_34 : f32 to vector<2x128xf32>
      %60 = arith.minimumf %59, %58 : vector<2x128xf32>
      %61 = vector.broadcast %12 : f32 to vector<2x128xf32>
      %62 = arith.mulf %7, %61 : vector<2x128xf32>
      %cst_35 = arith.constant 0.000000e+00 : f32
      %cst_36 = arith.constant 1.000000e+00 : f32
      %63 = vector.broadcast %cst_35 : f32 to vector<2x128xf32>
      %64 = arith.maximumf %63, %62 : vector<2x128xf32>
      %65 = vector.broadcast %cst_36 : f32 to vector<2x128xf32>
      %66 = arith.minimumf %65, %64 : vector<2x128xf32>
      %67 = vector.broadcast %12 : f32 to vector<2x128xf32>
      %68 = arith.mulf %10, %67 : vector<2x128xf32>
      %cst_37 = arith.constant 0.000000e+00 : f32
      %cst_38 = arith.constant 1.000000e+00 : f32
      %69 = vector.broadcast %cst_37 : f32 to vector<2x128xf32>
      %70 = arith.maximumf %69, %68 : vector<2x128xf32>
      %71 = vector.broadcast %cst_38 : f32 to vector<2x128xf32>
      %72 = arith.minimumf %71, %70 : vector<2x128xf32>
      scf.yield %60, %66, %72 : vector<2x128xf32>, vector<2x128xf32>, vector<2x128xf32>
    }
    %c1_12 = arith.constant 1 : index
    %25 = arith.index_cast %1 : i32 to index
    %26 = memref.load %arg1[%c1_12, %25] : memref<4x4xi32, #tpu.memory_space<smem>>
    %c0_i32_13 = arith.constant 0 : i32
    %c3_i32_14 = arith.constant 3 : i32
    %27 = arith.maxsi %26, %c0_i32_13 : i32
    %28 = arith.minsi %27, %c3_i32_14 : i32
    %c0_i32_15 = arith.constant 0 : i32
    %29 = arith.cmpi ne, %28, %c0_i32_15 : i32
    %30:3 = scf.if %29 -> (vector<2x128xf32>, vector<2x128xf32>, vector<2x128xf32>) {
      %c1_i32_34 = arith.constant 1 : i32
      %55 = arith.subi %28, %c1_i32_34 : i32
      %c0_i32_35 = arith.constant 0 : i32
      %56 = arith.cmpi ne, %55, %c0_i32_35 : i32
      %57:3 = scf.if %56 -> (vector<2x128xf32>, vector<2x128xf32>, vector<2x128xf32>) {
        %c1_i32_36 = arith.constant 1 : i32
        %58 = arith.subi %55, %c1_i32_36 : i32
        %c0_i32_37 = arith.constant 0 : i32
        %59 = arith.cmpi ne, %58, %c0_i32_37 : i32
        %60:3 = scf.if %59 -> (vector<2x128xf32>, vector<2x128xf32>, vector<2x128xf32>) {
          %61 = arith.maximumf %24#0, %24#1 : vector<2x128xf32>
          %62 = arith.maximumf %61, %24#2 : vector<2x128xf32>
          %63 = arith.minimumf %24#0, %24#1 : vector<2x128xf32>
          %64 = arith.minimumf %63, %24#2 : vector<2x128xf32>
          %65 = arith.cmpf oeq, %62, %64 : vector<2x128xf32>
          %66 = arith.subf %62, %64 : vector<2x128xf32>
          %cst = arith.constant 1.000000e+00 : f32
          %67 = vector.broadcast %cst : f32 to vector<2x128xf32>
          %68 = arith.select %65, %67, %62 : vector<2x128xi1>, vector<2x128xf32>
          %69 = tpu.reciprocal %68 {approx = true} : vector<2x128xf32> -> vector<2x128xf32>
          %70 = arith.select %65, %67, %66 : vector<2x128xi1>, vector<2x128xf32>
          %71 = tpu.reciprocal %70 {approx = true} : vector<2x128xf32> -> vector<2x128xf32>
          %72 = arith.mulf %70, %71 : vector<2x128xf32>
          %cst_38 = arith.constant 2.000000e+00 : f32
          %73 = vector.broadcast %cst_38 : f32 to vector<2x128xf32>
          %74 = arith.subf %73, %72 : vector<2x128xf32>
          %75 = arith.mulf %71, %74 : vector<2x128xf32>
          %76 = arith.mulf %66, %69 : vector<2x128xf32>
          %77 = arith.subf %62, %24#0 : vector<2x128xf32>
          %78 = arith.mulf %77, %75 : vector<2x128xf32>
          %79 = arith.subf %62, %24#1 : vector<2x128xf32>
          %80 = arith.mulf %79, %75 : vector<2x128xf32>
          %81 = arith.subf %62, %24#2 : vector<2x128xf32>
          %82 = arith.mulf %81, %75 : vector<2x128xf32>
          %83 = arith.cmpf oeq, %62, %24#0 : vector<2x128xf32>
          %84 = arith.cmpf oeq, %62, %24#1 : vector<2x128xf32>
          %cst_39 = arith.constant dense<true> : vector<2x128xi1>
          %85 = arith.xori %83, %cst_39 : vector<2x128xi1>
          %86 = arith.andi %84, %85 : vector<2x128xi1>
          %cst_40 = arith.constant dense<true> : vector<2x128xi1>
          %87 = arith.xori %86, %cst_40 : vector<2x128xi1>
          %cst_41 = arith.constant dense<true> : vector<2x128xi1>
          %88 = arith.xori %83, %cst_41 : vector<2x128xi1>
          %89 = arith.andi %87, %88 : vector<2x128xi1>
          %90 = arith.subf %82, %80 : vector<2x128xf32>
          %cst_42 = arith.constant 0.000000e+00 : f32
          %91 = vector.broadcast %cst_42 : f32 to vector<2x128xf32>
          %92 = arith.select %83, %90, %91 : vector<2x128xi1>, vector<2x128xf32>
          %cst_43 = arith.constant 2.000000e+00 : f32
          %93 = vector.broadcast %cst_43 : f32 to vector<2x128xf32>
          %94 = arith.addf %93, %78 : vector<2x128xf32>
          %95 = arith.subf %94, %82 : vector<2x128xf32>
          %cst_44 = arith.constant 0.000000e+00 : f32
          %96 = vector.broadcast %cst_44 : f32 to vector<2x128xf32>
          %97 = arith.select %86, %95, %96 : vector<2x128xi1>, vector<2x128xf32>
          %98 = arith.addf %92, %97 : vector<2x128xf32>
          %cst_45 = arith.constant 4.000000e+00 : f32
          %99 = vector.broadcast %cst_45 : f32 to vector<2x128xf32>
          %100 = arith.addf %99, %80 : vector<2x128xf32>
          %101 = arith.subf %100, %78 : vector<2x128xf32>
          %cst_46 = arith.constant 0.000000e+00 : f32
          %102 = vector.broadcast %cst_46 : f32 to vector<2x128xf32>
          %103 = arith.select %89, %101, %102 : vector<2x128xi1>, vector<2x128xf32>
          %104 = arith.addf %98, %103 : vector<2x128xf32>
          %cst_47 = arith.constant 0.166666672 : f32
          %105 = vector.broadcast %cst_47 : f32 to vector<2x128xf32>
          %106 = arith.mulf %104, %105 : vector<2x128xf32>
          %cst_48 = arith.constant 1.000000e+00 : f32
          %107 = vector.broadcast %cst_48 : f32 to vector<2x128xf32>
          %108 = arith.addf %106, %107 : vector<2x128xf32>
          %109 = math.floor %108 : vector<2x128xf32>
          %110 = arith.subf %108, %109 : vector<2x128xf32>
          %cst_49 = arith.constant 1.000000e+00 : f32
          %111 = vector.broadcast %cst_49 : f32 to vector<2x128xf32>
          %112 = arith.cmpf oge, %110, %111 : vector<2x128xf32>
          %cst_50 = arith.constant 1.000000e+00 : f32
          %113 = vector.broadcast %cst_50 : f32 to vector<2x128xf32>
          %114 = arith.subf %110, %113 : vector<2x128xf32>
          %115 = arith.select %112, %114, %110 : vector<2x128xi1>, vector<2x128xf32>
          %116 = vector.broadcast %18 : f32 to vector<2x128xf32>
          %117 = arith.addf %115, %116 : vector<2x128xf32>
          %118 = math.floor %117 : vector<2x128xf32>
          %119 = arith.subf %117, %118 : vector<2x128xf32>
          %cst_51 = arith.constant 1.000000e+00 : f32
          %120 = vector.broadcast %cst_51 : f32 to vector<2x128xf32>
          %121 = arith.cmpf oge, %119, %120 : vector<2x128xf32>
          %cst_52 = arith.constant 1.000000e+00 : f32
          %122 = vector.broadcast %cst_52 : f32 to vector<2x128xf32>
          %123 = arith.subf %119, %122 : vector<2x128xf32>
          %124 = arith.select %121, %123, %119 : vector<2x128xi1>, vector<2x128xf32>
          %cst_53 = arith.constant 6.000000e+00 : f32
          %125 = vector.broadcast %cst_53 : f32 to vector<2x128xf32>
          %126 = arith.mulf %124, %125 : vector<2x128xf32>
          %127 = math.floor %126 : vector<2x128xf32>
          %128 = arith.subf %126, %127 : vector<2x128xf32>
          %cst_54 = arith.constant 6.000000e+00 : f32
          %129 = vector.broadcast %cst_54 : f32 to vector<2x128xf32>
          %130 = arith.cmpf oge, %127, %129 : vector<2x128xf32>
          %cst_55 = arith.constant 6.000000e+00 : f32
          %131 = vector.broadcast %cst_55 : f32 to vector<2x128xf32>
          %132 = arith.subf %127, %131 : vector<2x128xf32>
          %133 = arith.select %130, %132, %127 : vector<2x128xi1>, vector<2x128xf32>
          %cst_56 = arith.constant 1.000000e+00 : f32
          %134 = vector.broadcast %cst_56 : f32 to vector<2x128xf32>
          %135 = arith.subf %134, %76 : vector<2x128xf32>
          %136 = arith.mulf %62, %135 : vector<2x128xf32>
          %cst_57 = arith.constant 0.000000e+00 : f32
          %cst_58 = arith.constant 1.000000e+00 : f32
          %137 = vector.broadcast %cst_57 : f32 to vector<2x128xf32>
          %138 = arith.maximumf %137, %136 : vector<2x128xf32>
          %139 = vector.broadcast %cst_58 : f32 to vector<2x128xf32>
          %140 = arith.minimumf %139, %138 : vector<2x128xf32>
          %141 = arith.mulf %76, %128 : vector<2x128xf32>
          %cst_59 = arith.constant 1.000000e+00 : f32
          %142 = vector.broadcast %cst_59 : f32 to vector<2x128xf32>
          %143 = arith.subf %142, %141 : vector<2x128xf32>
          %144 = arith.mulf %62, %143 : vector<2x128xf32>
          %cst_60 = arith.constant 0.000000e+00 : f32
          %cst_61 = arith.constant 1.000000e+00 : f32
          %145 = vector.broadcast %cst_60 : f32 to vector<2x128xf32>
          %146 = arith.maximumf %145, %144 : vector<2x128xf32>
          %147 = vector.broadcast %cst_61 : f32 to vector<2x128xf32>
          %148 = arith.minimumf %147, %146 : vector<2x128xf32>
          %cst_62 = arith.constant 1.000000e+00 : f32
          %149 = vector.broadcast %cst_62 : f32 to vector<2x128xf32>
          %150 = arith.subf %149, %128 : vector<2x128xf32>
          %151 = arith.mulf %76, %150 : vector<2x128xf32>
          %cst_63 = arith.constant 1.000000e+00 : f32
          %152 = vector.broadcast %cst_63 : f32 to vector<2x128xf32>
          %153 = arith.subf %152, %151 : vector<2x128xf32>
          %154 = arith.mulf %62, %153 : vector<2x128xf32>
          %cst_64 = arith.constant 0.000000e+00 : f32
          %cst_65 = arith.constant 1.000000e+00 : f32
          %155 = vector.broadcast %cst_64 : f32 to vector<2x128xf32>
          %156 = arith.maximumf %155, %154 : vector<2x128xf32>
          %157 = vector.broadcast %cst_65 : f32 to vector<2x128xf32>
          %158 = arith.minimumf %157, %156 : vector<2x128xf32>
          %cst_66 = arith.constant 0.000000e+00 : f32
          %159 = vector.broadcast %cst_66 : f32 to vector<2x128xf32>
          %160 = arith.cmpf oeq, %133, %159 : vector<2x128xf32>
          %cst_67 = arith.constant 1.000000e+00 : f32
          %161 = vector.broadcast %cst_67 : f32 to vector<2x128xf32>
          %162 = arith.cmpf oeq, %133, %161 : vector<2x128xf32>
          %cst_68 = arith.constant 2.000000e+00 : f32
          %163 = vector.broadcast %cst_68 : f32 to vector<2x128xf32>
          %164 = arith.cmpf oeq, %133, %163 : vector<2x128xf32>
          %cst_69 = arith.constant 3.000000e+00 : f32
          %165 = vector.broadcast %cst_69 : f32 to vector<2x128xf32>
          %166 = arith.cmpf oeq, %133, %165 : vector<2x128xf32>
          %cst_70 = arith.constant 4.000000e+00 : f32
          %167 = vector.broadcast %cst_70 : f32 to vector<2x128xf32>
          %168 = arith.cmpf oeq, %133, %167 : vector<2x128xf32>
          %169 = arith.select %168, %158, %62 : vector<2x128xi1>, vector<2x128xf32>
          %170 = arith.select %166, %140, %169 : vector<2x128xi1>, vector<2x128xf32>
          %171 = arith.select %164, %140, %170 : vector<2x128xi1>, vector<2x128xf32>
          %172 = arith.select %162, %148, %171 : vector<2x128xi1>, vector<2x128xf32>
          %173 = arith.select %160, %62, %172 : vector<2x128xi1>, vector<2x128xf32>
          %174 = arith.select %168, %140, %140 : vector<2x128xi1>, vector<2x128xf32>
          %175 = arith.select %166, %148, %174 : vector<2x128xi1>, vector<2x128xf32>
          %176 = arith.select %164, %62, %175 : vector<2x128xi1>, vector<2x128xf32>
          %177 = arith.select %162, %62, %176 : vector<2x128xi1>, vector<2x128xf32>
          %178 = arith.select %160, %158, %177 : vector<2x128xi1>, vector<2x128xf32>
          %179 = arith.select %168, %62, %148 : vector<2x128xi1>, vector<2x128xf32>
          %180 = arith.select %166, %62, %179 : vector<2x128xi1>, vector<2x128xf32>
          %181 = arith.select %164, %158, %180 : vector<2x128xi1>, vector<2x128xf32>
          %182 = arith.select %162, %140, %181 : vector<2x128xi1>, vector<2x128xf32>
          %183 = arith.select %160, %140, %182 : vector<2x128xi1>, vector<2x128xf32>
          scf.yield %173, %178, %183 : vector<2x128xf32>, vector<2x128xf32>, vector<2x128xf32>
        } else {
          %cst = arith.constant 1.000000e+00 : f32
          %61 = arith.subf %cst, %16 : f32
          %cst_38 = arith.constant 2.989000e-01 : f32
          %62 = vector.broadcast %cst_38 : f32 to vector<2x128xf32>
          %63 = arith.mulf %62, %24#0 : vector<2x128xf32>
          %cst_39 = arith.constant 5.870000e-01 : f32
          %64 = vector.broadcast %cst_39 : f32 to vector<2x128xf32>
          %65 = arith.mulf %64, %24#1 : vector<2x128xf32>
          %66 = arith.addf %63, %65 : vector<2x128xf32>
          %cst_40 = arith.constant 1.140000e-01 : f32
          %67 = vector.broadcast %cst_40 : f32 to vector<2x128xf32>
          %68 = arith.mulf %67, %24#2 : vector<2x128xf32>
          %69 = arith.addf %66, %68 : vector<2x128xf32>
          %70 = vector.broadcast %61 : f32 to vector<2x128xf32>
          %71 = arith.mulf %70, %69 : vector<2x128xf32>
          %72 = vector.broadcast %16 : f32 to vector<2x128xf32>
          %73 = arith.mulf %72, %24#0 : vector<2x128xf32>
          %74 = arith.addf %73, %71 : vector<2x128xf32>
          %cst_41 = arith.constant 0.000000e+00 : f32
          %cst_42 = arith.constant 1.000000e+00 : f32
          %75 = vector.broadcast %cst_41 : f32 to vector<2x128xf32>
          %76 = arith.maximumf %75, %74 : vector<2x128xf32>
          %77 = vector.broadcast %cst_42 : f32 to vector<2x128xf32>
          %78 = arith.minimumf %77, %76 : vector<2x128xf32>
          %79 = vector.broadcast %16 : f32 to vector<2x128xf32>
          %80 = arith.mulf %79, %24#1 : vector<2x128xf32>
          %81 = arith.addf %80, %71 : vector<2x128xf32>
          %cst_43 = arith.constant 0.000000e+00 : f32
          %cst_44 = arith.constant 1.000000e+00 : f32
          %82 = vector.broadcast %cst_43 : f32 to vector<2x128xf32>
          %83 = arith.maximumf %82, %81 : vector<2x128xf32>
          %84 = vector.broadcast %cst_44 : f32 to vector<2x128xf32>
          %85 = arith.minimumf %84, %83 : vector<2x128xf32>
          %86 = vector.broadcast %16 : f32 to vector<2x128xf32>
          %87 = arith.mulf %86, %24#2 : vector<2x128xf32>
          %88 = arith.addf %87, %71 : vector<2x128xf32>
          %cst_45 = arith.constant 0.000000e+00 : f32
          %cst_46 = arith.constant 1.000000e+00 : f32
          %89 = vector.broadcast %cst_45 : f32 to vector<2x128xf32>
          %90 = arith.maximumf %89, %88 : vector<2x128xf32>
          %91 = vector.broadcast %cst_46 : f32 to vector<2x128xf32>
          %92 = arith.minimumf %91, %90 : vector<2x128xf32>
          scf.yield %78, %85, %92 : vector<2x128xf32>, vector<2x128xf32>, vector<2x128xf32>
        }
        scf.yield %60#0, %60#1, %60#2 : vector<2x128xf32>, vector<2x128xf32>, vector<2x128xf32>
      } else {
        %cst = arith.constant 2.989000e-01 : f32
        %58 = vector.broadcast %cst : f32 to vector<2x128xf32>
        %59 = arith.mulf %58, %24#0 : vector<2x128xf32>
        %cst_36 = arith.constant 5.870000e-01 : f32
        %60 = vector.broadcast %cst_36 : f32 to vector<2x128xf32>
        %61 = arith.mulf %60, %24#1 : vector<2x128xf32>
        %62 = arith.addf %59, %61 : vector<2x128xf32>
        %cst_37 = arith.constant 1.140000e-01 : f32
        %63 = vector.broadcast %cst_37 : f32 to vector<2x128xf32>
        %64 = arith.mulf %63, %24#2 : vector<2x128xf32>
        %65 = arith.addf %62, %64 : vector<2x128xf32>
        %66 = vector.shape_cast %65 : vector<2x128xf32> to vector<1x2x128xf32>
        %cst_38 = arith.constant dense<0.000000e+00> : vector<1xf32>
        %67 = vector.multi_reduction <add>, %66, %cst_38 [1, 2] : vector<1x2x128xf32> to vector<1xf32>
        %68 = vector.shape_cast %67 : vector<1xf32> to vector<1x1x1xf32>
        %69 = vector.extract %68[0, 0, 0] : f32 from vector<1x1x1xf32>
        %cst_39 = arith.constant 3.906250e-03 : f32
        %70 = arith.mulf %69, %cst_39 : f32
        %cst_40 = arith.constant 1.000000e+00 : f32
        %71 = arith.subf %cst_40, %14 : f32
        %72 = arith.mulf %71, %70 : f32
        %73 = vector.broadcast %14 : f32 to vector<2x128xf32>
        %74 = arith.mulf %73, %24#0 : vector<2x128xf32>
        %75 = vector.broadcast %72 : f32 to vector<2x128xf32>
        %76 = arith.addf %74, %75 : vector<2x128xf32>
        %cst_41 = arith.constant 0.000000e+00 : f32
        %cst_42 = arith.constant 1.000000e+00 : f32
        %77 = vector.broadcast %cst_41 : f32 to vector<2x128xf32>
        %78 = arith.maximumf %77, %76 : vector<2x128xf32>
        %79 = vector.broadcast %cst_42 : f32 to vector<2x128xf32>
        %80 = arith.minimumf %79, %78 : vector<2x128xf32>
        %81 = vector.broadcast %14 : f32 to vector<2x128xf32>
        %82 = arith.mulf %81, %24#1 : vector<2x128xf32>
        %83 = vector.broadcast %72 : f32 to vector<2x128xf32>
        %84 = arith.addf %82, %83 : vector<2x128xf32>
        %cst_43 = arith.constant 0.000000e+00 : f32
        %cst_44 = arith.constant 1.000000e+00 : f32
        %85 = vector.broadcast %cst_43 : f32 to vector<2x128xf32>
        %86 = arith.maximumf %85, %84 : vector<2x128xf32>
        %87 = vector.broadcast %cst_44 : f32 to vector<2x128xf32>
        %88 = arith.minimumf %87, %86 : vector<2x128xf32>
        %89 = vector.broadcast %14 : f32 to vector<2x128xf32>
        %90 = arith.mulf %89, %24#2 : vector<2x128xf32>
        %91 = vector.broadcast %72 : f32 to vector<2x128xf32>
        %92 = arith.addf %90, %91 : vector<2x128xf32>
        %cst_45 = arith.constant 0.000000e+00 : f32
        %cst_46 = arith.constant 1.000000e+00 : f32
        %93 = vector.broadcast %cst_45 : f32 to vector<2x128xf32>
        %94 = arith.maximumf %93, %92 : vector<2x128xf32>
        %95 = vector.broadcast %cst_46 : f32 to vector<2x128xf32>
        %96 = arith.minimumf %95, %94 : vector<2x128xf32>
        scf.yield %80, %88, %96 : vector<2x128xf32>, vector<2x128xf32>, vector<2x128xf32>
      }
      scf.yield %57#0, %57#1, %57#2 : vector<2x128xf32>, vector<2x128xf32>, vector<2x128xf32>
    } else {
      %55 = vector.broadcast %12 : f32 to vector<2x128xf32>
      %56 = arith.mulf %24#0, %55 : vector<2x128xf32>
      %cst = arith.constant 0.000000e+00 : f32
      %cst_34 = arith.constant 1.000000e+00 : f32
      %57 = vector.broadcast %cst : f32 to vector<2x128xf32>
      %58 = arith.maximumf %57, %56 : vector<2x128xf32>
      %59 = vector.broadcast %cst_34 : f32 to vector<2x128xf32>
      %60 = arith.minimumf %59, %58 : vector<2x128xf32>
      %61 = vector.broadcast %12 : f32 to vector<2x128xf32>
      %62 = arith.mulf %24#1, %61 : vector<2x128xf32>
      %cst_35 = arith.constant 0.000000e+00 : f32
      %cst_36 = arith.constant 1.000000e+00 : f32
      %63 = vector.broadcast %cst_35 : f32 to vector<2x128xf32>
      %64 = arith.maximumf %63, %62 : vector<2x128xf32>
      %65 = vector.broadcast %cst_36 : f32 to vector<2x128xf32>
      %66 = arith.minimumf %65, %64 : vector<2x128xf32>
      %67 = vector.broadcast %12 : f32 to vector<2x128xf32>
      %68 = arith.mulf %24#2, %67 : vector<2x128xf32>
      %cst_37 = arith.constant 0.000000e+00 : f32
      %cst_38 = arith.constant 1.000000e+00 : f32
      %69 = vector.broadcast %cst_37 : f32 to vector<2x128xf32>
      %70 = arith.maximumf %69, %68 : vector<2x128xf32>
      %71 = vector.broadcast %cst_38 : f32 to vector<2x128xf32>
      %72 = arith.minimumf %71, %70 : vector<2x128xf32>
      scf.yield %60, %66, %72 : vector<2x128xf32>, vector<2x128xf32>, vector<2x128xf32>
    }
    %c2_16 = arith.constant 2 : index
    %31 = arith.index_cast %1 : i32 to index
    %32 = memref.load %arg1[%c2_16, %31] : memref<4x4xi32, #tpu.memory_space<smem>>
    %c0_i32_17 = arith.constant 0 : i32
    %c3_i32_18 = arith.constant 3 : i32
    %33 = arith.maxsi %32, %c0_i32_17 : i32
    %34 = arith.minsi %33, %c3_i32_18 : i32
    %c0_i32_19 = arith.constant 0 : i32
    %35 = arith.cmpi ne, %34, %c0_i32_19 : i32
    %36:3 = scf.if %35 -> (vector<2x128xf32>, vector<2x128xf32>, vector<2x128xf32>) {
      %c1_i32_34 = arith.constant 1 : i32
      %55 = arith.subi %34, %c1_i32_34 : i32
      %c0_i32_35 = arith.constant 0 : i32
      %56 = arith.cmpi ne, %55, %c0_i32_35 : i32
      %57:3 = scf.if %56 -> (vector<2x128xf32>, vector<2x128xf32>, vector<2x128xf32>) {
        %c1_i32_36 = arith.constant 1 : i32
        %58 = arith.subi %55, %c1_i32_36 : i32
        %c0_i32_37 = arith.constant 0 : i32
        %59 = arith.cmpi ne, %58, %c0_i32_37 : i32
        %60:3 = scf.if %59 -> (vector<2x128xf32>, vector<2x128xf32>, vector<2x128xf32>) {
          %61 = arith.maximumf %30#0, %30#1 : vector<2x128xf32>
          %62 = arith.maximumf %61, %30#2 : vector<2x128xf32>
          %63 = arith.minimumf %30#0, %30#1 : vector<2x128xf32>
          %64 = arith.minimumf %63, %30#2 : vector<2x128xf32>
          %65 = arith.cmpf oeq, %62, %64 : vector<2x128xf32>
          %66 = arith.subf %62, %64 : vector<2x128xf32>
          %cst = arith.constant 1.000000e+00 : f32
          %67 = vector.broadcast %cst : f32 to vector<2x128xf32>
          %68 = arith.select %65, %67, %62 : vector<2x128xi1>, vector<2x128xf32>
          %69 = tpu.reciprocal %68 {approx = true} : vector<2x128xf32> -> vector<2x128xf32>
          %70 = arith.select %65, %67, %66 : vector<2x128xi1>, vector<2x128xf32>
          %71 = tpu.reciprocal %70 {approx = true} : vector<2x128xf32> -> vector<2x128xf32>
          %72 = arith.mulf %70, %71 : vector<2x128xf32>
          %cst_38 = arith.constant 2.000000e+00 : f32
          %73 = vector.broadcast %cst_38 : f32 to vector<2x128xf32>
          %74 = arith.subf %73, %72 : vector<2x128xf32>
          %75 = arith.mulf %71, %74 : vector<2x128xf32>
          %76 = arith.mulf %66, %69 : vector<2x128xf32>
          %77 = arith.subf %62, %30#0 : vector<2x128xf32>
          %78 = arith.mulf %77, %75 : vector<2x128xf32>
          %79 = arith.subf %62, %30#1 : vector<2x128xf32>
          %80 = arith.mulf %79, %75 : vector<2x128xf32>
          %81 = arith.subf %62, %30#2 : vector<2x128xf32>
          %82 = arith.mulf %81, %75 : vector<2x128xf32>
          %83 = arith.cmpf oeq, %62, %30#0 : vector<2x128xf32>
          %84 = arith.cmpf oeq, %62, %30#1 : vector<2x128xf32>
          %cst_39 = arith.constant dense<true> : vector<2x128xi1>
          %85 = arith.xori %83, %cst_39 : vector<2x128xi1>
          %86 = arith.andi %84, %85 : vector<2x128xi1>
          %cst_40 = arith.constant dense<true> : vector<2x128xi1>
          %87 = arith.xori %86, %cst_40 : vector<2x128xi1>
          %cst_41 = arith.constant dense<true> : vector<2x128xi1>
          %88 = arith.xori %83, %cst_41 : vector<2x128xi1>
          %89 = arith.andi %87, %88 : vector<2x128xi1>
          %90 = arith.subf %82, %80 : vector<2x128xf32>
          %cst_42 = arith.constant 0.000000e+00 : f32
          %91 = vector.broadcast %cst_42 : f32 to vector<2x128xf32>
          %92 = arith.select %83, %90, %91 : vector<2x128xi1>, vector<2x128xf32>
          %cst_43 = arith.constant 2.000000e+00 : f32
          %93 = vector.broadcast %cst_43 : f32 to vector<2x128xf32>
          %94 = arith.addf %93, %78 : vector<2x128xf32>
          %95 = arith.subf %94, %82 : vector<2x128xf32>
          %cst_44 = arith.constant 0.000000e+00 : f32
          %96 = vector.broadcast %cst_44 : f32 to vector<2x128xf32>
          %97 = arith.select %86, %95, %96 : vector<2x128xi1>, vector<2x128xf32>
          %98 = arith.addf %92, %97 : vector<2x128xf32>
          %cst_45 = arith.constant 4.000000e+00 : f32
          %99 = vector.broadcast %cst_45 : f32 to vector<2x128xf32>
          %100 = arith.addf %99, %80 : vector<2x128xf32>
          %101 = arith.subf %100, %78 : vector<2x128xf32>
          %cst_46 = arith.constant 0.000000e+00 : f32
          %102 = vector.broadcast %cst_46 : f32 to vector<2x128xf32>
          %103 = arith.select %89, %101, %102 : vector<2x128xi1>, vector<2x128xf32>
          %104 = arith.addf %98, %103 : vector<2x128xf32>
          %cst_47 = arith.constant 0.166666672 : f32
          %105 = vector.broadcast %cst_47 : f32 to vector<2x128xf32>
          %106 = arith.mulf %104, %105 : vector<2x128xf32>
          %cst_48 = arith.constant 1.000000e+00 : f32
          %107 = vector.broadcast %cst_48 : f32 to vector<2x128xf32>
          %108 = arith.addf %106, %107 : vector<2x128xf32>
          %109 = math.floor %108 : vector<2x128xf32>
          %110 = arith.subf %108, %109 : vector<2x128xf32>
          %cst_49 = arith.constant 1.000000e+00 : f32
          %111 = vector.broadcast %cst_49 : f32 to vector<2x128xf32>
          %112 = arith.cmpf oge, %110, %111 : vector<2x128xf32>
          %cst_50 = arith.constant 1.000000e+00 : f32
          %113 = vector.broadcast %cst_50 : f32 to vector<2x128xf32>
          %114 = arith.subf %110, %113 : vector<2x128xf32>
          %115 = arith.select %112, %114, %110 : vector<2x128xi1>, vector<2x128xf32>
          %116 = vector.broadcast %18 : f32 to vector<2x128xf32>
          %117 = arith.addf %115, %116 : vector<2x128xf32>
          %118 = math.floor %117 : vector<2x128xf32>
          %119 = arith.subf %117, %118 : vector<2x128xf32>
          %cst_51 = arith.constant 1.000000e+00 : f32
          %120 = vector.broadcast %cst_51 : f32 to vector<2x128xf32>
          %121 = arith.cmpf oge, %119, %120 : vector<2x128xf32>
          %cst_52 = arith.constant 1.000000e+00 : f32
          %122 = vector.broadcast %cst_52 : f32 to vector<2x128xf32>
          %123 = arith.subf %119, %122 : vector<2x128xf32>
          %124 = arith.select %121, %123, %119 : vector<2x128xi1>, vector<2x128xf32>
          %cst_53 = arith.constant 6.000000e+00 : f32
          %125 = vector.broadcast %cst_53 : f32 to vector<2x128xf32>
          %126 = arith.mulf %124, %125 : vector<2x128xf32>
          %127 = math.floor %126 : vector<2x128xf32>
          %128 = arith.subf %126, %127 : vector<2x128xf32>
          %cst_54 = arith.constant 6.000000e+00 : f32
          %129 = vector.broadcast %cst_54 : f32 to vector<2x128xf32>
          %130 = arith.cmpf oge, %127, %129 : vector<2x128xf32>
          %cst_55 = arith.constant 6.000000e+00 : f32
          %131 = vector.broadcast %cst_55 : f32 to vector<2x128xf32>
          %132 = arith.subf %127, %131 : vector<2x128xf32>
          %133 = arith.select %130, %132, %127 : vector<2x128xi1>, vector<2x128xf32>
          %cst_56 = arith.constant 1.000000e+00 : f32
          %134 = vector.broadcast %cst_56 : f32 to vector<2x128xf32>
          %135 = arith.subf %134, %76 : vector<2x128xf32>
          %136 = arith.mulf %62, %135 : vector<2x128xf32>
          %cst_57 = arith.constant 0.000000e+00 : f32
          %cst_58 = arith.constant 1.000000e+00 : f32
          %137 = vector.broadcast %cst_57 : f32 to vector<2x128xf32>
          %138 = arith.maximumf %137, %136 : vector<2x128xf32>
          %139 = vector.broadcast %cst_58 : f32 to vector<2x128xf32>
          %140 = arith.minimumf %139, %138 : vector<2x128xf32>
          %141 = arith.mulf %76, %128 : vector<2x128xf32>
          %cst_59 = arith.constant 1.000000e+00 : f32
          %142 = vector.broadcast %cst_59 : f32 to vector<2x128xf32>
          %143 = arith.subf %142, %141 : vector<2x128xf32>
          %144 = arith.mulf %62, %143 : vector<2x128xf32>
          %cst_60 = arith.constant 0.000000e+00 : f32
          %cst_61 = arith.constant 1.000000e+00 : f32
          %145 = vector.broadcast %cst_60 : f32 to vector<2x128xf32>
          %146 = arith.maximumf %145, %144 : vector<2x128xf32>
          %147 = vector.broadcast %cst_61 : f32 to vector<2x128xf32>
          %148 = arith.minimumf %147, %146 : vector<2x128xf32>
          %cst_62 = arith.constant 1.000000e+00 : f32
          %149 = vector.broadcast %cst_62 : f32 to vector<2x128xf32>
          %150 = arith.subf %149, %128 : vector<2x128xf32>
          %151 = arith.mulf %76, %150 : vector<2x128xf32>
          %cst_63 = arith.constant 1.000000e+00 : f32
          %152 = vector.broadcast %cst_63 : f32 to vector<2x128xf32>
          %153 = arith.subf %152, %151 : vector<2x128xf32>
          %154 = arith.mulf %62, %153 : vector<2x128xf32>
          %cst_64 = arith.constant 0.000000e+00 : f32
          %cst_65 = arith.constant 1.000000e+00 : f32
          %155 = vector.broadcast %cst_64 : f32 to vector<2x128xf32>
          %156 = arith.maximumf %155, %154 : vector<2x128xf32>
          %157 = vector.broadcast %cst_65 : f32 to vector<2x128xf32>
          %158 = arith.minimumf %157, %156 : vector<2x128xf32>
          %cst_66 = arith.constant 0.000000e+00 : f32
          %159 = vector.broadcast %cst_66 : f32 to vector<2x128xf32>
          %160 = arith.cmpf oeq, %133, %159 : vector<2x128xf32>
          %cst_67 = arith.constant 1.000000e+00 : f32
          %161 = vector.broadcast %cst_67 : f32 to vector<2x128xf32>
          %162 = arith.cmpf oeq, %133, %161 : vector<2x128xf32>
          %cst_68 = arith.constant 2.000000e+00 : f32
          %163 = vector.broadcast %cst_68 : f32 to vector<2x128xf32>
          %164 = arith.cmpf oeq, %133, %163 : vector<2x128xf32>
          %cst_69 = arith.constant 3.000000e+00 : f32
          %165 = vector.broadcast %cst_69 : f32 to vector<2x128xf32>
          %166 = arith.cmpf oeq, %133, %165 : vector<2x128xf32>
          %cst_70 = arith.constant 4.000000e+00 : f32
          %167 = vector.broadcast %cst_70 : f32 to vector<2x128xf32>
          %168 = arith.cmpf oeq, %133, %167 : vector<2x128xf32>
          %169 = arith.select %168, %158, %62 : vector<2x128xi1>, vector<2x128xf32>
          %170 = arith.select %166, %140, %169 : vector<2x128xi1>, vector<2x128xf32>
          %171 = arith.select %164, %140, %170 : vector<2x128xi1>, vector<2x128xf32>
          %172 = arith.select %162, %148, %171 : vector<2x128xi1>, vector<2x128xf32>
          %173 = arith.select %160, %62, %172 : vector<2x128xi1>, vector<2x128xf32>
          %174 = arith.select %168, %140, %140 : vector<2x128xi1>, vector<2x128xf32>
          %175 = arith.select %166, %148, %174 : vector<2x128xi1>, vector<2x128xf32>
          %176 = arith.select %164, %62, %175 : vector<2x128xi1>, vector<2x128xf32>
          %177 = arith.select %162, %62, %176 : vector<2x128xi1>, vector<2x128xf32>
          %178 = arith.select %160, %158, %177 : vector<2x128xi1>, vector<2x128xf32>
          %179 = arith.select %168, %62, %148 : vector<2x128xi1>, vector<2x128xf32>
          %180 = arith.select %166, %62, %179 : vector<2x128xi1>, vector<2x128xf32>
          %181 = arith.select %164, %158, %180 : vector<2x128xi1>, vector<2x128xf32>
          %182 = arith.select %162, %140, %181 : vector<2x128xi1>, vector<2x128xf32>
          %183 = arith.select %160, %140, %182 : vector<2x128xi1>, vector<2x128xf32>
          scf.yield %173, %178, %183 : vector<2x128xf32>, vector<2x128xf32>, vector<2x128xf32>
        } else {
          %cst = arith.constant 1.000000e+00 : f32
          %61 = arith.subf %cst, %16 : f32
          %cst_38 = arith.constant 2.989000e-01 : f32
          %62 = vector.broadcast %cst_38 : f32 to vector<2x128xf32>
          %63 = arith.mulf %62, %30#0 : vector<2x128xf32>
          %cst_39 = arith.constant 5.870000e-01 : f32
          %64 = vector.broadcast %cst_39 : f32 to vector<2x128xf32>
          %65 = arith.mulf %64, %30#1 : vector<2x128xf32>
          %66 = arith.addf %63, %65 : vector<2x128xf32>
          %cst_40 = arith.constant 1.140000e-01 : f32
          %67 = vector.broadcast %cst_40 : f32 to vector<2x128xf32>
          %68 = arith.mulf %67, %30#2 : vector<2x128xf32>
          %69 = arith.addf %66, %68 : vector<2x128xf32>
          %70 = vector.broadcast %61 : f32 to vector<2x128xf32>
          %71 = arith.mulf %70, %69 : vector<2x128xf32>
          %72 = vector.broadcast %16 : f32 to vector<2x128xf32>
          %73 = arith.mulf %72, %30#0 : vector<2x128xf32>
          %74 = arith.addf %73, %71 : vector<2x128xf32>
          %cst_41 = arith.constant 0.000000e+00 : f32
          %cst_42 = arith.constant 1.000000e+00 : f32
          %75 = vector.broadcast %cst_41 : f32 to vector<2x128xf32>
          %76 = arith.maximumf %75, %74 : vector<2x128xf32>
          %77 = vector.broadcast %cst_42 : f32 to vector<2x128xf32>
          %78 = arith.minimumf %77, %76 : vector<2x128xf32>
          %79 = vector.broadcast %16 : f32 to vector<2x128xf32>
          %80 = arith.mulf %79, %30#1 : vector<2x128xf32>
          %81 = arith.addf %80, %71 : vector<2x128xf32>
          %cst_43 = arith.constant 0.000000e+00 : f32
          %cst_44 = arith.constant 1.000000e+00 : f32
          %82 = vector.broadcast %cst_43 : f32 to vector<2x128xf32>
          %83 = arith.maximumf %82, %81 : vector<2x128xf32>
          %84 = vector.broadcast %cst_44 : f32 to vector<2x128xf32>
          %85 = arith.minimumf %84, %83 : vector<2x128xf32>
          %86 = vector.broadcast %16 : f32 to vector<2x128xf32>
          %87 = arith.mulf %86, %30#2 : vector<2x128xf32>
          %88 = arith.addf %87, %71 : vector<2x128xf32>
          %cst_45 = arith.constant 0.000000e+00 : f32
          %cst_46 = arith.constant 1.000000e+00 : f32
          %89 = vector.broadcast %cst_45 : f32 to vector<2x128xf32>
          %90 = arith.maximumf %89, %88 : vector<2x128xf32>
          %91 = vector.broadcast %cst_46 : f32 to vector<2x128xf32>
          %92 = arith.minimumf %91, %90 : vector<2x128xf32>
          scf.yield %78, %85, %92 : vector<2x128xf32>, vector<2x128xf32>, vector<2x128xf32>
        }
        scf.yield %60#0, %60#1, %60#2 : vector<2x128xf32>, vector<2x128xf32>, vector<2x128xf32>
      } else {
        %cst = arith.constant 2.989000e-01 : f32
        %58 = vector.broadcast %cst : f32 to vector<2x128xf32>
        %59 = arith.mulf %58, %30#0 : vector<2x128xf32>
        %cst_36 = arith.constant 5.870000e-01 : f32
        %60 = vector.broadcast %cst_36 : f32 to vector<2x128xf32>
        %61 = arith.mulf %60, %30#1 : vector<2x128xf32>
        %62 = arith.addf %59, %61 : vector<2x128xf32>
        %cst_37 = arith.constant 1.140000e-01 : f32
        %63 = vector.broadcast %cst_37 : f32 to vector<2x128xf32>
        %64 = arith.mulf %63, %30#2 : vector<2x128xf32>
        %65 = arith.addf %62, %64 : vector<2x128xf32>
        %66 = vector.shape_cast %65 : vector<2x128xf32> to vector<1x2x128xf32>
        %cst_38 = arith.constant dense<0.000000e+00> : vector<1xf32>
        %67 = vector.multi_reduction <add>, %66, %cst_38 [1, 2] : vector<1x2x128xf32> to vector<1xf32>
        %68 = vector.shape_cast %67 : vector<1xf32> to vector<1x1x1xf32>
        %69 = vector.extract %68[0, 0, 0] : f32 from vector<1x1x1xf32>
        %cst_39 = arith.constant 3.906250e-03 : f32
        %70 = arith.mulf %69, %cst_39 : f32
        %cst_40 = arith.constant 1.000000e+00 : f32
        %71 = arith.subf %cst_40, %14 : f32
        %72 = arith.mulf %71, %70 : f32
        %73 = vector.broadcast %14 : f32 to vector<2x128xf32>
        %74 = arith.mulf %73, %30#0 : vector<2x128xf32>
        %75 = vector.broadcast %72 : f32 to vector<2x128xf32>
        %76 = arith.addf %74, %75 : vector<2x128xf32>
        %cst_41 = arith.constant 0.000000e+00 : f32
        %cst_42 = arith.constant 1.000000e+00 : f32
        %77 = vector.broadcast %cst_41 : f32 to vector<2x128xf32>
        %78 = arith.maximumf %77, %76 : vector<2x128xf32>
        %79 = vector.broadcast %cst_42 : f32 to vector<2x128xf32>
        %80 = arith.minimumf %79, %78 : vector<2x128xf32>
        %81 = vector.broadcast %14 : f32 to vector<2x128xf32>
        %82 = arith.mulf %81, %30#1 : vector<2x128xf32>
        %83 = vector.broadcast %72 : f32 to vector<2x128xf32>
        %84 = arith.addf %82, %83 : vector<2x128xf32>
        %cst_43 = arith.constant 0.000000e+00 : f32
        %cst_44 = arith.constant 1.000000e+00 : f32
        %85 = vector.broadcast %cst_43 : f32 to vector<2x128xf32>
        %86 = arith.maximumf %85, %84 : vector<2x128xf32>
        %87 = vector.broadcast %cst_44 : f32 to vector<2x128xf32>
        %88 = arith.minimumf %87, %86 : vector<2x128xf32>
        %89 = vector.broadcast %14 : f32 to vector<2x128xf32>
        %90 = arith.mulf %89, %30#2 : vector<2x128xf32>
        %91 = vector.broadcast %72 : f32 to vector<2x128xf32>
        %92 = arith.addf %90, %91 : vector<2x128xf32>
        %cst_45 = arith.constant 0.000000e+00 : f32
        %cst_46 = arith.constant 1.000000e+00 : f32
        %93 = vector.broadcast %cst_45 : f32 to vector<2x128xf32>
        %94 = arith.maximumf %93, %92 : vector<2x128xf32>
        %95 = vector.broadcast %cst_46 : f32 to vector<2x128xf32>
        %96 = arith.minimumf %95, %94 : vector<2x128xf32>
        scf.yield %80, %88, %96 : vector<2x128xf32>, vector<2x128xf32>, vector<2x128xf32>
      }
      scf.yield %57#0, %57#1, %57#2 : vector<2x128xf32>, vector<2x128xf32>, vector<2x128xf32>
    } else {
      %55 = vector.broadcast %12 : f32 to vector<2x128xf32>
      %56 = arith.mulf %30#0, %55 : vector<2x128xf32>
      %cst = arith.constant 0.000000e+00 : f32
      %cst_34 = arith.constant 1.000000e+00 : f32
      %57 = vector.broadcast %cst : f32 to vector<2x128xf32>
      %58 = arith.maximumf %57, %56 : vector<2x128xf32>
      %59 = vector.broadcast %cst_34 : f32 to vector<2x128xf32>
      %60 = arith.minimumf %59, %58 : vector<2x128xf32>
      %61 = vector.broadcast %12 : f32 to vector<2x128xf32>
      %62 = arith.mulf %30#1, %61 : vector<2x128xf32>
      %cst_35 = arith.constant 0.000000e+00 : f32
      %cst_36 = arith.constant 1.000000e+00 : f32
      %63 = vector.broadcast %cst_35 : f32 to vector<2x128xf32>
      %64 = arith.maximumf %63, %62 : vector<2x128xf32>
      %65 = vector.broadcast %cst_36 : f32 to vector<2x128xf32>
      %66 = arith.minimumf %65, %64 : vector<2x128xf32>
      %67 = vector.broadcast %12 : f32 to vector<2x128xf32>
      %68 = arith.mulf %30#2, %67 : vector<2x128xf32>
      %cst_37 = arith.constant 0.000000e+00 : f32
      %cst_38 = arith.constant 1.000000e+00 : f32
      %69 = vector.broadcast %cst_37 : f32 to vector<2x128xf32>
      %70 = arith.maximumf %69, %68 : vector<2x128xf32>
      %71 = vector.broadcast %cst_38 : f32 to vector<2x128xf32>
      %72 = arith.minimumf %71, %70 : vector<2x128xf32>
      scf.yield %60, %66, %72 : vector<2x128xf32>, vector<2x128xf32>, vector<2x128xf32>
    }
    %c3_20 = arith.constant 3 : index
    %37 = arith.index_cast %1 : i32 to index
    %38 = memref.load %arg1[%c3_20, %37] : memref<4x4xi32, #tpu.memory_space<smem>>
    %c0_i32_21 = arith.constant 0 : i32
    %c3_i32_22 = arith.constant 3 : i32
    %39 = arith.maxsi %38, %c0_i32_21 : i32
    %40 = arith.minsi %39, %c3_i32_22 : i32
    %c0_i32_23 = arith.constant 0 : i32
    %41 = arith.cmpi ne, %40, %c0_i32_23 : i32
    %42:3 = scf.if %41 -> (vector<2x128xf32>, vector<2x128xf32>, vector<2x128xf32>) {
      %c1_i32_34 = arith.constant 1 : i32
      %55 = arith.subi %40, %c1_i32_34 : i32
      %c0_i32_35 = arith.constant 0 : i32
      %56 = arith.cmpi ne, %55, %c0_i32_35 : i32
      %57:3 = scf.if %56 -> (vector<2x128xf32>, vector<2x128xf32>, vector<2x128xf32>) {
        %c1_i32_36 = arith.constant 1 : i32
        %58 = arith.subi %55, %c1_i32_36 : i32
        %c0_i32_37 = arith.constant 0 : i32
        %59 = arith.cmpi ne, %58, %c0_i32_37 : i32
        %60:3 = scf.if %59 -> (vector<2x128xf32>, vector<2x128xf32>, vector<2x128xf32>) {
          %61 = arith.maximumf %36#0, %36#1 : vector<2x128xf32>
          %62 = arith.maximumf %61, %36#2 : vector<2x128xf32>
          %63 = arith.minimumf %36#0, %36#1 : vector<2x128xf32>
          %64 = arith.minimumf %63, %36#2 : vector<2x128xf32>
          %65 = arith.cmpf oeq, %62, %64 : vector<2x128xf32>
          %66 = arith.subf %62, %64 : vector<2x128xf32>
          %cst = arith.constant 1.000000e+00 : f32
          %67 = vector.broadcast %cst : f32 to vector<2x128xf32>
          %68 = arith.select %65, %67, %62 : vector<2x128xi1>, vector<2x128xf32>
          %69 = tpu.reciprocal %68 {approx = true} : vector<2x128xf32> -> vector<2x128xf32>
          %70 = arith.select %65, %67, %66 : vector<2x128xi1>, vector<2x128xf32>
          %71 = tpu.reciprocal %70 {approx = true} : vector<2x128xf32> -> vector<2x128xf32>
          %72 = arith.mulf %70, %71 : vector<2x128xf32>
          %cst_38 = arith.constant 2.000000e+00 : f32
          %73 = vector.broadcast %cst_38 : f32 to vector<2x128xf32>
          %74 = arith.subf %73, %72 : vector<2x128xf32>
          %75 = arith.mulf %71, %74 : vector<2x128xf32>
          %76 = arith.mulf %66, %69 : vector<2x128xf32>
          %77 = arith.subf %62, %36#0 : vector<2x128xf32>
          %78 = arith.mulf %77, %75 : vector<2x128xf32>
          %79 = arith.subf %62, %36#1 : vector<2x128xf32>
          %80 = arith.mulf %79, %75 : vector<2x128xf32>
          %81 = arith.subf %62, %36#2 : vector<2x128xf32>
          %82 = arith.mulf %81, %75 : vector<2x128xf32>
          %83 = arith.cmpf oeq, %62, %36#0 : vector<2x128xf32>
          %84 = arith.cmpf oeq, %62, %36#1 : vector<2x128xf32>
          %cst_39 = arith.constant dense<true> : vector<2x128xi1>
          %85 = arith.xori %83, %cst_39 : vector<2x128xi1>
          %86 = arith.andi %84, %85 : vector<2x128xi1>
          %cst_40 = arith.constant dense<true> : vector<2x128xi1>
          %87 = arith.xori %86, %cst_40 : vector<2x128xi1>
          %cst_41 = arith.constant dense<true> : vector<2x128xi1>
          %88 = arith.xori %83, %cst_41 : vector<2x128xi1>
          %89 = arith.andi %87, %88 : vector<2x128xi1>
          %90 = arith.subf %82, %80 : vector<2x128xf32>
          %cst_42 = arith.constant 0.000000e+00 : f32
          %91 = vector.broadcast %cst_42 : f32 to vector<2x128xf32>
          %92 = arith.select %83, %90, %91 : vector<2x128xi1>, vector<2x128xf32>
          %cst_43 = arith.constant 2.000000e+00 : f32
          %93 = vector.broadcast %cst_43 : f32 to vector<2x128xf32>
          %94 = arith.addf %93, %78 : vector<2x128xf32>
          %95 = arith.subf %94, %82 : vector<2x128xf32>
          %cst_44 = arith.constant 0.000000e+00 : f32
          %96 = vector.broadcast %cst_44 : f32 to vector<2x128xf32>
          %97 = arith.select %86, %95, %96 : vector<2x128xi1>, vector<2x128xf32>
          %98 = arith.addf %92, %97 : vector<2x128xf32>
          %cst_45 = arith.constant 4.000000e+00 : f32
          %99 = vector.broadcast %cst_45 : f32 to vector<2x128xf32>
          %100 = arith.addf %99, %80 : vector<2x128xf32>
          %101 = arith.subf %100, %78 : vector<2x128xf32>
          %cst_46 = arith.constant 0.000000e+00 : f32
          %102 = vector.broadcast %cst_46 : f32 to vector<2x128xf32>
          %103 = arith.select %89, %101, %102 : vector<2x128xi1>, vector<2x128xf32>
          %104 = arith.addf %98, %103 : vector<2x128xf32>
          %cst_47 = arith.constant 0.166666672 : f32
          %105 = vector.broadcast %cst_47 : f32 to vector<2x128xf32>
          %106 = arith.mulf %104, %105 : vector<2x128xf32>
          %cst_48 = arith.constant 1.000000e+00 : f32
          %107 = vector.broadcast %cst_48 : f32 to vector<2x128xf32>
          %108 = arith.addf %106, %107 : vector<2x128xf32>
          %109 = math.floor %108 : vector<2x128xf32>
          %110 = arith.subf %108, %109 : vector<2x128xf32>
          %cst_49 = arith.constant 1.000000e+00 : f32
          %111 = vector.broadcast %cst_49 : f32 to vector<2x128xf32>
          %112 = arith.cmpf oge, %110, %111 : vector<2x128xf32>
          %cst_50 = arith.constant 1.000000e+00 : f32
          %113 = vector.broadcast %cst_50 : f32 to vector<2x128xf32>
          %114 = arith.subf %110, %113 : vector<2x128xf32>
          %115 = arith.select %112, %114, %110 : vector<2x128xi1>, vector<2x128xf32>
          %116 = vector.broadcast %18 : f32 to vector<2x128xf32>
          %117 = arith.addf %115, %116 : vector<2x128xf32>
          %118 = math.floor %117 : vector<2x128xf32>
          %119 = arith.subf %117, %118 : vector<2x128xf32>
          %cst_51 = arith.constant 1.000000e+00 : f32
          %120 = vector.broadcast %cst_51 : f32 to vector<2x128xf32>
          %121 = arith.cmpf oge, %119, %120 : vector<2x128xf32>
          %cst_52 = arith.constant 1.000000e+00 : f32
          %122 = vector.broadcast %cst_52 : f32 to vector<2x128xf32>
          %123 = arith.subf %119, %122 : vector<2x128xf32>
          %124 = arith.select %121, %123, %119 : vector<2x128xi1>, vector<2x128xf32>
          %cst_53 = arith.constant 6.000000e+00 : f32
          %125 = vector.broadcast %cst_53 : f32 to vector<2x128xf32>
          %126 = arith.mulf %124, %125 : vector<2x128xf32>
          %127 = math.floor %126 : vector<2x128xf32>
          %128 = arith.subf %126, %127 : vector<2x128xf32>
          %cst_54 = arith.constant 6.000000e+00 : f32
          %129 = vector.broadcast %cst_54 : f32 to vector<2x128xf32>
          %130 = arith.cmpf oge, %127, %129 : vector<2x128xf32>
          %cst_55 = arith.constant 6.000000e+00 : f32
          %131 = vector.broadcast %cst_55 : f32 to vector<2x128xf32>
          %132 = arith.subf %127, %131 : vector<2x128xf32>
          %133 = arith.select %130, %132, %127 : vector<2x128xi1>, vector<2x128xf32>
          %cst_56 = arith.constant 1.000000e+00 : f32
          %134 = vector.broadcast %cst_56 : f32 to vector<2x128xf32>
          %135 = arith.subf %134, %76 : vector<2x128xf32>
          %136 = arith.mulf %62, %135 : vector<2x128xf32>
          %cst_57 = arith.constant 0.000000e+00 : f32
          %cst_58 = arith.constant 1.000000e+00 : f32
          %137 = vector.broadcast %cst_57 : f32 to vector<2x128xf32>
          %138 = arith.maximumf %137, %136 : vector<2x128xf32>
          %139 = vector.broadcast %cst_58 : f32 to vector<2x128xf32>
          %140 = arith.minimumf %139, %138 : vector<2x128xf32>
          %141 = arith.mulf %76, %128 : vector<2x128xf32>
          %cst_59 = arith.constant 1.000000e+00 : f32
          %142 = vector.broadcast %cst_59 : f32 to vector<2x128xf32>
          %143 = arith.subf %142, %141 : vector<2x128xf32>
          %144 = arith.mulf %62, %143 : vector<2x128xf32>
          %cst_60 = arith.constant 0.000000e+00 : f32
          %cst_61 = arith.constant 1.000000e+00 : f32
          %145 = vector.broadcast %cst_60 : f32 to vector<2x128xf32>
          %146 = arith.maximumf %145, %144 : vector<2x128xf32>
          %147 = vector.broadcast %cst_61 : f32 to vector<2x128xf32>
          %148 = arith.minimumf %147, %146 : vector<2x128xf32>
          %cst_62 = arith.constant 1.000000e+00 : f32
          %149 = vector.broadcast %cst_62 : f32 to vector<2x128xf32>
          %150 = arith.subf %149, %128 : vector<2x128xf32>
          %151 = arith.mulf %76, %150 : vector<2x128xf32>
          %cst_63 = arith.constant 1.000000e+00 : f32
          %152 = vector.broadcast %cst_63 : f32 to vector<2x128xf32>
          %153 = arith.subf %152, %151 : vector<2x128xf32>
          %154 = arith.mulf %62, %153 : vector<2x128xf32>
          %cst_64 = arith.constant 0.000000e+00 : f32
          %cst_65 = arith.constant 1.000000e+00 : f32
          %155 = vector.broadcast %cst_64 : f32 to vector<2x128xf32>
          %156 = arith.maximumf %155, %154 : vector<2x128xf32>
          %157 = vector.broadcast %cst_65 : f32 to vector<2x128xf32>
          %158 = arith.minimumf %157, %156 : vector<2x128xf32>
          %cst_66 = arith.constant 0.000000e+00 : f32
          %159 = vector.broadcast %cst_66 : f32 to vector<2x128xf32>
          %160 = arith.cmpf oeq, %133, %159 : vector<2x128xf32>
          %cst_67 = arith.constant 1.000000e+00 : f32
          %161 = vector.broadcast %cst_67 : f32 to vector<2x128xf32>
          %162 = arith.cmpf oeq, %133, %161 : vector<2x128xf32>
          %cst_68 = arith.constant 2.000000e+00 : f32
          %163 = vector.broadcast %cst_68 : f32 to vector<2x128xf32>
          %164 = arith.cmpf oeq, %133, %163 : vector<2x128xf32>
          %cst_69 = arith.constant 3.000000e+00 : f32
          %165 = vector.broadcast %cst_69 : f32 to vector<2x128xf32>
          %166 = arith.cmpf oeq, %133, %165 : vector<2x128xf32>
          %cst_70 = arith.constant 4.000000e+00 : f32
          %167 = vector.broadcast %cst_70 : f32 to vector<2x128xf32>
          %168 = arith.cmpf oeq, %133, %167 : vector<2x128xf32>
          %169 = arith.select %168, %158, %62 : vector<2x128xi1>, vector<2x128xf32>
          %170 = arith.select %166, %140, %169 : vector<2x128xi1>, vector<2x128xf32>
          %171 = arith.select %164, %140, %170 : vector<2x128xi1>, vector<2x128xf32>
          %172 = arith.select %162, %148, %171 : vector<2x128xi1>, vector<2x128xf32>
          %173 = arith.select %160, %62, %172 : vector<2x128xi1>, vector<2x128xf32>
          %174 = arith.select %168, %140, %140 : vector<2x128xi1>, vector<2x128xf32>
          %175 = arith.select %166, %148, %174 : vector<2x128xi1>, vector<2x128xf32>
          %176 = arith.select %164, %62, %175 : vector<2x128xi1>, vector<2x128xf32>
          %177 = arith.select %162, %62, %176 : vector<2x128xi1>, vector<2x128xf32>
          %178 = arith.select %160, %158, %177 : vector<2x128xi1>, vector<2x128xf32>
          %179 = arith.select %168, %62, %148 : vector<2x128xi1>, vector<2x128xf32>
          %180 = arith.select %166, %62, %179 : vector<2x128xi1>, vector<2x128xf32>
          %181 = arith.select %164, %158, %180 : vector<2x128xi1>, vector<2x128xf32>
          %182 = arith.select %162, %140, %181 : vector<2x128xi1>, vector<2x128xf32>
          %183 = arith.select %160, %140, %182 : vector<2x128xi1>, vector<2x128xf32>
          scf.yield %173, %178, %183 : vector<2x128xf32>, vector<2x128xf32>, vector<2x128xf32>
        } else {
          %cst = arith.constant 1.000000e+00 : f32
          %61 = arith.subf %cst, %16 : f32
          %cst_38 = arith.constant 2.989000e-01 : f32
          %62 = vector.broadcast %cst_38 : f32 to vector<2x128xf32>
          %63 = arith.mulf %62, %36#0 : vector<2x128xf32>
          %cst_39 = arith.constant 5.870000e-01 : f32
          %64 = vector.broadcast %cst_39 : f32 to vector<2x128xf32>
          %65 = arith.mulf %64, %36#1 : vector<2x128xf32>
          %66 = arith.addf %63, %65 : vector<2x128xf32>
          %cst_40 = arith.constant 1.140000e-01 : f32
          %67 = vector.broadcast %cst_40 : f32 to vector<2x128xf32>
          %68 = arith.mulf %67, %36#2 : vector<2x128xf32>
          %69 = arith.addf %66, %68 : vector<2x128xf32>
          %70 = vector.broadcast %61 : f32 to vector<2x128xf32>
          %71 = arith.mulf %70, %69 : vector<2x128xf32>
          %72 = vector.broadcast %16 : f32 to vector<2x128xf32>
          %73 = arith.mulf %72, %36#0 : vector<2x128xf32>
          %74 = arith.addf %73, %71 : vector<2x128xf32>
          %cst_41 = arith.constant 0.000000e+00 : f32
          %cst_42 = arith.constant 1.000000e+00 : f32
          %75 = vector.broadcast %cst_41 : f32 to vector<2x128xf32>
          %76 = arith.maximumf %75, %74 : vector<2x128xf32>
          %77 = vector.broadcast %cst_42 : f32 to vector<2x128xf32>
          %78 = arith.minimumf %77, %76 : vector<2x128xf32>
          %79 = vector.broadcast %16 : f32 to vector<2x128xf32>
          %80 = arith.mulf %79, %36#1 : vector<2x128xf32>
          %81 = arith.addf %80, %71 : vector<2x128xf32>
          %cst_43 = arith.constant 0.000000e+00 : f32
          %cst_44 = arith.constant 1.000000e+00 : f32
          %82 = vector.broadcast %cst_43 : f32 to vector<2x128xf32>
          %83 = arith.maximumf %82, %81 : vector<2x128xf32>
          %84 = vector.broadcast %cst_44 : f32 to vector<2x128xf32>
          %85 = arith.minimumf %84, %83 : vector<2x128xf32>
          %86 = vector.broadcast %16 : f32 to vector<2x128xf32>
          %87 = arith.mulf %86, %36#2 : vector<2x128xf32>
          %88 = arith.addf %87, %71 : vector<2x128xf32>
          %cst_45 = arith.constant 0.000000e+00 : f32
          %cst_46 = arith.constant 1.000000e+00 : f32
          %89 = vector.broadcast %cst_45 : f32 to vector<2x128xf32>
          %90 = arith.maximumf %89, %88 : vector<2x128xf32>
          %91 = vector.broadcast %cst_46 : f32 to vector<2x128xf32>
          %92 = arith.minimumf %91, %90 : vector<2x128xf32>
          scf.yield %78, %85, %92 : vector<2x128xf32>, vector<2x128xf32>, vector<2x128xf32>
        }
        scf.yield %60#0, %60#1, %60#2 : vector<2x128xf32>, vector<2x128xf32>, vector<2x128xf32>
      } else {
        %cst = arith.constant 2.989000e-01 : f32
        %58 = vector.broadcast %cst : f32 to vector<2x128xf32>
        %59 = arith.mulf %58, %36#0 : vector<2x128xf32>
        %cst_36 = arith.constant 5.870000e-01 : f32
        %60 = vector.broadcast %cst_36 : f32 to vector<2x128xf32>
        %61 = arith.mulf %60, %36#1 : vector<2x128xf32>
        %62 = arith.addf %59, %61 : vector<2x128xf32>
        %cst_37 = arith.constant 1.140000e-01 : f32
        %63 = vector.broadcast %cst_37 : f32 to vector<2x128xf32>
        %64 = arith.mulf %63, %36#2 : vector<2x128xf32>
        %65 = arith.addf %62, %64 : vector<2x128xf32>
        %66 = vector.shape_cast %65 : vector<2x128xf32> to vector<1x2x128xf32>
        %cst_38 = arith.constant dense<0.000000e+00> : vector<1xf32>
        %67 = vector.multi_reduction <add>, %66, %cst_38 [1, 2] : vector<1x2x128xf32> to vector<1xf32>
        %68 = vector.shape_cast %67 : vector<1xf32> to vector<1x1x1xf32>
        %69 = vector.extract %68[0, 0, 0] : f32 from vector<1x1x1xf32>
        %cst_39 = arith.constant 3.906250e-03 : f32
        %70 = arith.mulf %69, %cst_39 : f32
        %cst_40 = arith.constant 1.000000e+00 : f32
        %71 = arith.subf %cst_40, %14 : f32
        %72 = arith.mulf %71, %70 : f32
        %73 = vector.broadcast %14 : f32 to vector<2x128xf32>
        %74 = arith.mulf %73, %36#0 : vector<2x128xf32>
        %75 = vector.broadcast %72 : f32 to vector<2x128xf32>
        %76 = arith.addf %74, %75 : vector<2x128xf32>
        %cst_41 = arith.constant 0.000000e+00 : f32
        %cst_42 = arith.constant 1.000000e+00 : f32
        %77 = vector.broadcast %cst_41 : f32 to vector<2x128xf32>
        %78 = arith.maximumf %77, %76 : vector<2x128xf32>
        %79 = vector.broadcast %cst_42 : f32 to vector<2x128xf32>
        %80 = arith.minimumf %79, %78 : vector<2x128xf32>
        %81 = vector.broadcast %14 : f32 to vector<2x128xf32>
        %82 = arith.mulf %81, %36#1 : vector<2x128xf32>
        %83 = vector.broadcast %72 : f32 to vector<2x128xf32>
        %84 = arith.addf %82, %83 : vector<2x128xf32>
        %cst_43 = arith.constant 0.000000e+00 : f32
        %cst_44 = arith.constant 1.000000e+00 : f32
        %85 = vector.broadcast %cst_43 : f32 to vector<2x128xf32>
        %86 = arith.maximumf %85, %84 : vector<2x128xf32>
        %87 = vector.broadcast %cst_44 : f32 to vector<2x128xf32>
        %88 = arith.minimumf %87, %86 : vector<2x128xf32>
        %89 = vector.broadcast %14 : f32 to vector<2x128xf32>
        %90 = arith.mulf %89, %36#2 : vector<2x128xf32>
        %91 = vector.broadcast %72 : f32 to vector<2x128xf32>
        %92 = arith.addf %90, %91 : vector<2x128xf32>
        %cst_45 = arith.constant 0.000000e+00 : f32
        %cst_46 = arith.constant 1.000000e+00 : f32
        %93 = vector.broadcast %cst_45 : f32 to vector<2x128xf32>
        %94 = arith.maximumf %93, %92 : vector<2x128xf32>
        %95 = vector.broadcast %cst_46 : f32 to vector<2x128xf32>
        %96 = arith.minimumf %95, %94 : vector<2x128xf32>
        scf.yield %80, %88, %96 : vector<2x128xf32>, vector<2x128xf32>, vector<2x128xf32>
      }
      scf.yield %57#0, %57#1, %57#2 : vector<2x128xf32>, vector<2x128xf32>, vector<2x128xf32>
    } else {
      %55 = vector.broadcast %12 : f32 to vector<2x128xf32>
      %56 = arith.mulf %36#0, %55 : vector<2x128xf32>
      %cst = arith.constant 0.000000e+00 : f32
      %cst_34 = arith.constant 1.000000e+00 : f32
      %57 = vector.broadcast %cst : f32 to vector<2x128xf32>
      %58 = arith.maximumf %57, %56 : vector<2x128xf32>
      %59 = vector.broadcast %cst_34 : f32 to vector<2x128xf32>
      %60 = arith.minimumf %59, %58 : vector<2x128xf32>
      %61 = vector.broadcast %12 : f32 to vector<2x128xf32>
      %62 = arith.mulf %36#1, %61 : vector<2x128xf32>
      %cst_35 = arith.constant 0.000000e+00 : f32
      %cst_36 = arith.constant 1.000000e+00 : f32
      %63 = vector.broadcast %cst_35 : f32 to vector<2x128xf32>
      %64 = arith.maximumf %63, %62 : vector<2x128xf32>
      %65 = vector.broadcast %cst_36 : f32 to vector<2x128xf32>
      %66 = arith.minimumf %65, %64 : vector<2x128xf32>
      %67 = vector.broadcast %12 : f32 to vector<2x128xf32>
      %68 = arith.mulf %36#2, %67 : vector<2x128xf32>
      %cst_37 = arith.constant 0.000000e+00 : f32
      %cst_38 = arith.constant 1.000000e+00 : f32
      %69 = vector.broadcast %cst_37 : f32 to vector<2x128xf32>
      %70 = arith.maximumf %69, %68 : vector<2x128xf32>
      %71 = vector.broadcast %cst_38 : f32 to vector<2x128xf32>
      %72 = arith.minimumf %71, %70 : vector<2x128xf32>
      scf.yield %60, %66, %72 : vector<2x128xf32>, vector<2x128xf32>, vector<2x128xf32>
    }
    %43 = arith.index_cast %c0_i32 : i32 to index
    %c0_24 = arith.constant 0 : index
    %c0_25 = arith.constant 0 : index
    %c0_26 = arith.constant 0 : index
    %44 = vector.load %arg4[%43, %c0_24, %c0_25, %c0_26] : memref<1x3x2x128xf32, #tpu.memory_space<vmem>>, vector<1x1x2x128xf32>
    %45 = vector.shape_cast %44 : vector<1x1x2x128xf32> to vector<2x128xf32>
    %46 = vector.shape_cast %42#0 : vector<2x128xf32> to vector<1x1x2x128xf32>
    tpu.vector_store %arg4[%43, %c0_24, %c0_25, %c0_26], %46 {strides = array<i32>} : memref<1x3x2x128xf32, #tpu.memory_space<vmem>>, vector<1x1x2x128xf32>,
    %47 = arith.index_cast %c0_i32 : i32 to index
    %c1_27 = arith.constant 1 : index
    %c0_28 = arith.constant 0 : index
    %c0_29 = arith.constant 0 : index
    %48 = vector.load %arg4[%47, %c1_27, %c0_28, %c0_29] : memref<1x3x2x128xf32, #tpu.memory_space<vmem>>, vector<1x1x2x128xf32>
    %49 = vector.shape_cast %48 : vector<1x1x2x128xf32> to vector<2x128xf32>
    %50 = vector.shape_cast %42#1 : vector<2x128xf32> to vector<1x1x2x128xf32>
    tpu.vector_store %arg4[%47, %c1_27, %c0_28, %c0_29], %50 {strides = array<i32>} : memref<1x3x2x128xf32, #tpu.memory_space<vmem>>, vector<1x1x2x128xf32>,
    %51 = arith.index_cast %c0_i32 : i32 to index
    %c2_30 = arith.constant 2 : index
    %c0_31 = arith.constant 0 : index
    %c0_32 = arith.constant 0 : index
    %52 = vector.load %arg4[%51, %c2_30, %c0_31, %c0_32] : memref<1x3x2x128xf32, #tpu.memory_space<vmem>>, vector<1x1x2x128xf32>
    %53 = vector.shape_cast %52 : vector<1x1x2x128xf32> to vector<2x128xf32>
    %54 = vector.shape_cast %42#2 : vector<2x128xf32> to vector<1x1x2x128xf32>
    tpu.vector_store %arg4[%51, %c2_30, %c0_31, %c0_32], %54 {strides = array<i32>} : memref<1x3x2x128xf32, #tpu.memory_space<vmem>>, vector<1x1x2x128xf32>,
    %c1_i32_33 = arith.constant 1 : i32
    return
  }
  func.func @transform_0(%arg0: i32, %arg1: memref<4x4xi32, #tpu.memory_space<smem>>, %arg2: memref<4x4xf32, #tpu.memory_space<smem>>) -> (i32, i32, i32, i32) {
    %c0_i32 = arith.constant 0 : i32
    %c0_i32_0 = arith.constant 0 : i32
    %c0_i32_1 = arith.constant 0 : i32
    %c0_i32_2 = arith.constant 0 : i32
    return %arg0, %c0_i32, %c0_i32_0, %c0_i32_1 : i32, i32, i32, i32
  }
  func.func @transform_1(%arg0: i32, %arg1: memref<4x4xi32, #tpu.memory_space<smem>>, %arg2: memref<4x4xf32, #tpu.memory_space<smem>>) -> (i32, i32, i32, i32) {
    %c0_i32 = arith.constant 0 : i32
    %c0_i32_0 = arith.constant 0 : i32
    %c0_i32_1 = arith.constant 0 : i32
    %c0_i32_2 = arith.constant 0 : i32
    return %arg0, %c0_i32, %c0_i32_0, %c0_i32_1 : i32, i32, i32, i32
  }
}

</mosaic_0001>

<bundles_post_ra>
// kernel: tpu_custom_call.1
= control target key start
LH: loop header
LB: loop body
LE: loop exit
PB: predicated region body
PF: predicated region fallthrough
CT: control target
= control target key end

     0   :  { %s2078_s12 = smov [#allocation3]   ;;  %s2079_s15 = smov [#allocation4]   ;;  %s2911_s0 = inlined_call_operand.hbm [shape: s32[4,4], index: 0, kind: input, shape index: {}]   ;;  %s2912_s2 = inlined_call_operand.hbm [shape: f32[4,3,2,128], index: 2, kind: input, shape index: {}]   ;;  %s2913_s3 = inlined_call_operand.hbm [shape: f32[4,3,2,128], index: 3, kind: output, shape index: {}]   ;;  %s2914_s1 = inlined_call_operand.hbm [shape: f32[4,4], index: 1, kind: input, shape index: {}]  }
   0x1   :  { %9 = dma.hbm_to_smem %s2911_s0, 64, %s2078_s12, [#allocation2] }
   0x2   :  { %11 = dma.hbm_to_smem %s2914_s1, 64, %s2079_s15, [#allocation2] }
   0x3   :  { %1908 = dma.done.wait [#allocation2], 128 }
   0x4   :  { %1909 = vsyncadd [#allocation2], 4294967168 }
   0x5   :  { %13 = sfence }
   0x6   :  { %14 = vsyncpa [#allocation6], 0 }
   0x7   :  { %16 = vsyncpa [#allocation6 + $0x1], 0 }
   0x8   :  { %17 = vsyncpa [#allocation7], 0 }
   0x9   :  { %19 = vsyncpa [#allocation7 + $0x1], 0  ;;  %s2116_s18 = smov 0   ;;  %s2118_s19 = smov 0  }
   0xa   :  { %s2120_s20 = smov 0   ;;  %s2122_s21 = smov 0  }
   0xb LB: > { %s2137_s0 = sadd.s32 4294967295, %s1932_s21   ;;  %s1057_s1 = sadd.s32 4294967294, %s1932_s21   ;;  %s1932_s21 = sphi %s2122_s21, %s2947_s21   ;;  %s1928_s20 = sphi %s2120_s20, %s2946_s20   ;;  %s1924_s19 = sphi %s2118_s19, %s2945_s19   ;;  %s1920_s18 = sphi %s2116_s18, %s2944_s18  }
   0xc   : > { %s2141_s22 = sadd.s32 1, %s1932_s21   ;;  %s32_s23 = sadd.s32 1, %s1928_s20 }
   0xd   : > { %s29_s24 = ssub.s32 %s1932_s21, %s2141_s22  ;;  %p39_p0 = scmp.ne.s32.totalorder %s1928_s20, %s1924_s19 }
   0xe   : > { %p30_p1 = scmp.eq.s32.totalorder %s29_s24, 0  ;;  %p40_p2 = scmp.eq.s32.totalorder %s1932_s21, 0 }
   0xf   : > { %p45_p3 = scmp.ne.s32.totalorder %s1924_s19, %s1920_s18  ;;  %p46_p4 = scmp.eq.s32.totalorder %s2137_s0, 0 }
  0x10   : > { %s2153_s25 = scalar_select %p30_p1, %s1928_s20, %s32_s23  }
  0x11   : > { %p41_p5 = por %p40_p2, %p39_p0  ;;  %p2155_p6 = por %p46_p4, %p45_p3 }
  0x12   : > { %p69_p7 = scmp.eq.s32.totalorder %s2137_s0, 3  ;;  %p75_p8 = scmp.eq.s32.totalorder %s1057_s1, 3 }
  0x13   : > { %s2917_s26 = scalar_select %p2155_p6, 1, 0 }
  0x14   : > { %p1318_p9 = scmp.lt.s32.totalorder %s1932_s21, 4  ;;  %p2161_p10 = por %p69_p7, %p39_p0 }
  0x15   : > { %p2165_p11 = por %p75_p8, %p45_p3  ;;  %s95_s29 = sand.u32 1, %s1928_s20  }
  0x16   : > { %s2918_s27 = scalar_select %p2161_p10, 1, 0 }
  0x17   : > { %s2919_s28 = scalar_select %p2165_p11, 1, 0 }
  0x18   : > { %s1139_s30 = smul.u32 96, %s1932_s21  ;;  %p2176_p12 = pnand %p1318_p9, %p41_p5 }
  0x19   : > { %s1138_s4 = smul.u32 6, %s95_s29  ;;  %s2182_s11 = scalar_lea.sflag [#allocation6], %s95_s29 }
  0x1a   : > { %s2174_s7 = scalar_lea.hbm %s2912_s2, %s1139_s30  ;;  %p1696_p0 = pneg %p2176_p12 }
  0x1b   : > { %s99_s9 = scalar_lea.vmem [#allocation5], %s1138_s4  ;;  %s1694_s12 = scalar_lea.hbm %s2174_s7, 96 }
  0x1c   : > { %s106_s10 = sshll.u32 %s99_s9, 4  ;;  %p1695_p13 = scmp.ne.s32.totalorder %s2174_s7, %s1694_s12  ;;  %s2180_s10 = int_to_ptr.vmem [resolvable:$true] %s106_s10 }
  0x1d   : > { %s1699_s15 = scalar_lea.hbm %s2912_s2, 384  ;;  %p1700_p3 = scmp.lt.s32.totalorder %s2174_s7, %s2912_s2 }
  0x1e   : > { %p1697_p1 = pnand %p1696_p0, %p1695_p13  ;;  %p1701_p4 = scmp.lt.s32.totalorder %s1699_s15, %s1694_s12 }
  0x20   : > { %p1698_p2 = pneg %p1697_p1  ;;  %p1702_p5 = por %p1701_p4, %p1700_p3 }
  0x22   : > { %p1703_p7 = pnand %p1702_p5, %p1698_p2 }
  0x24   : > { %1706 = shalt.err (!%p1703_p7)
}
  0x25   : > { %s1707_s1 = scalar_lea.vmem %s2180_s10, 96  ;;  %s2080_s23 = smov [#allocation5]  }
  0x26   : > { %p1708_p8 = scmp.ne.s32.totalorder %s2180_s10, %s1707_s1  ;;  %s1712_s24 = sshll.u32 %s2080_s23, 4  ;;  %s1713_s24 = int_to_ptr.vmem [resolvable:$false] %s1712_s24 }
  0x27   : > { %s1714_s29 = scalar_lea.vmem %s1713_s24, 192  ;;  %p1715_p1 = scmp.lt.s32.totalorder %s2180_s10, %s1713_s24 }
  0x28   : > { %p1710_p9 = pnand %p1708_p8, %p1696_p0  ;;  %p1716_p11 = scmp.lt.s32.totalorder %s1714_s29, %s1707_s1 }
  0x2a   : > { %p1711_p13 = pneg %p1710_p9  ;;  %p1717_p10 = por %p1716_p11, %p1715_p1 }
  0x2c   : > { %p1718_p6 = pnand %p1717_p10, %p1711_p13 }
  0x2e   : > { %1721 = shalt.err (!%p1718_p6)
}
  0x2f   : > { %s2081_s30 = smov 32   ;;  %s2082_s4 = smov 2  }
  0x30   : > { %1313 = dma.hbm_to_vmem [thread:$0]  (!%p2176_p12), %s2174_s7, 96, %s2180_s10, %s2182_s11, %s2081_s30, %s2081_s30, %s2082_s4  }
  0x31   : > { %p1061_p0 = scmp.ge.s32.totalorder %s1932_s21, 1  ;;  %p114_p2 = scmp.lt.s32.totalorder %s1932_s21, 5 }
  0x33   : > { %p115_p3 = pnand %p1061_p0, %p114_p2 }
  0x34   : > { %s2206_s5 = sand.u32 (!%p115_p3), 1, %s1924_s19   ;;  %p2921_p6 = scmp.ne.s32.totalorder (!%p115_p3), %s2917_s26, 0 }
  0x35   : > { %118 = sbr.rel (%p115_p3) target bundleno = 1403 (0x57b), region = 24  ;;  %s121_s9 = scalar_lea.sflag (!%p115_p3), [#allocation6], %s2206_s5 }
  0x36   : > { %s1140_s6 = smul.u32 (!%p115_p3), 6, %s2206_s5 }
  0x38   : > { %s124_s12 = scalar_lea.vmem (!%p115_p3), [#allocation5], %s1140_s6 }
  0x3a   : > { %1911 = dma.done.wait (%p2921_p6), %s121_s9, 96  }
  0x3b   : > { %1913 = vsyncadd (%p2921_p6), %s121_s9, 4294967200  ;;  %s149_s7 = sshra.s32 %s2137_s0, 7  ;;  %s154_s8 = sand.u32 127, %s2137_s0  ;;  %v2234_v0 = vld [vmem:[%s124_s12] sm:$0x3]  ;;  %v2246_v3 = vmov 0  }
  0x3c   : > { %s2217_s10 = sld [smem:[#allocation4 + %s2137_s0]]  ;;  %s1124_s11 = sshll.u32 %s149_s7, 7  ;;  %v2236_v1 = vld [vmem:[%s124_s12 + $0x2] sm:$0x3]  ;;  %v2238_v2 = vld [vmem:[%s124_s12 + $0x4] sm:$0x3] }
  0x3d   : > { %s1125_s13 = sadd.s32 128, %s1124_s11  ;;  %s1127_s14 = sadd.s32 256, %s1124_s11  ;;  %v2248_v4 = vmov 0   ;;  %v2250_v5 = vmov 0  }
  0x3e   : > { %s2219_s15 = sadd.s32 %s1125_s13, %s154_s8  ;;  %s2221_s16 = sadd.s32 %s1127_s14, %s154_s8 }
  0x3f   : > { %s2224_s17 = sld [smem:[#allocation4 + %s2219_s15]]  ;;  %s1129_s26 = sadd.s32 384, %s1124_s11 }
  0x40   : > { %s2227_s1 = sld [smem:[#allocation4 + %s2221_s16]]  ;;  %s2229_s23 = sadd.s32 %s1129_s26, %s154_s8 }
  0x41   : > { %s2232_s24 = sld [smem:[#allocation4 + %s2229_s23]]  ;;  %s2243_s30 = scalar_lea.vmem [#allocation8], %s1140_s6 }
  0x42   : > { %s165_s29 = sld [smem:[#allocation3 + %s2137_s0]] }
  0x48   : > { %p166_p10 = scmp.gt.s32.totalorder %s165_s29, 0  ;;  %p1067_p11 = scmp.lt.s32.totalorder %s165_s29, 3 }
  0x4a   : > { %s2949_s29 = smov (!%p166_p10, %s165_s29), 0 }
  0x4b   : > { %s2951_s29 = smov (!%p1067_p11, %s2949_s29), 3 }
  0x4c   : > { %p1072_p12 = scmp.eq.s32.totalorder %s2951_s29, 0 }
  0x4d   : > { %s1073_s4 = sadd.s32 (!%p1072_p12), 4294967295, %s2951_s29 }
  0x4e   : > { %173 = sbr.rel (%p1072_p12) target bundleno = 393 (0x189), region = 32  ;;  %p2255_p4 = scmp.ne.s32.totalorder (!%p1072_p12), %s1073_s4, 0 }
  0x4f   : > { %p1074_p5 = scmp.eq.s32.totalorder (!%p1072_p12), %s1073_s4, 0 }
  0x53   : > { %v2259_v6 = vmov 0   ;;  %v2261_v7 = vmov 0   ;;  %v2263_v8 = vmov 0   ;;  %178 = sbr.rel (%p1074_p5) target bundleno = 171 (0xab), region = 36  ;;  %s280_s6 = ssub.f32 (!%p1074_p5), 1.0, %s2227_s1 }
  0x54   : > { %s1075_s12 = sadd.s32 (!%p1074_p5), 4294967294, %s2951_s29 }
  0x55   : > { %p2311_p7 = scmp.ne.s32.totalorder (!%p1074_p5), %s1075_s12, 0  ;;  %p2316_p8 = scmp.eq.s32.totalorder (!%p1074_p5), %s1075_s12, 0 }
  0x58   : > { %v184_v9 = vmax.f32 %v2234_v0, %v2236_v1  ;;  %v186_v10 = vmin.f32 %v2234_v0, %v2236_v1  ;;  %vm2083_vm3 = vmmov 1   ;;  %v227_v42 = vstv %s2232_s24  ;;  %s1153_s11 = scalar_select %p2311_p7, 1, 0 }
  0x59   : > { %v281_v46 = vmul.f32 0.2989, %v2234_v0  ;;  %v282_v47 = vmul.f32 0.587, %v2236_v1  ;;  %v284_v52 = vmul.f32 0.114, %v2238_v2  ;;  %v286_v59 = vstv %s280_s6 }
  0x5a   : > { %v2270_v11 = vmax.f32 %v184_v9, %v2238_v2  ;;  %v187_v12 = vmin.f32 %v186_v10, %v2238_v2  ;;  %v288_v60 = vstv %s2227_s1  ;;  %s1166_s13 = scalar_select %p2316_p8, 1, 0 }
  0x5b   : > { %v283_v51 = vadd.f32 %v282_v47, %v281_v46  ;;  %v293_v3 = vmul.f32 %v2236_v1, %v288_v60  ;;  %v297_v7 = vmul.f32 %v2238_v2, %v288_v60  ;;  %v289_v8 = vmul.f32 %v288_v60, %v2234_v0 }
  0x5c   : > { %vm188_vm0 = vcmp.eq.f32.partialorder %v2270_v11, %v187_v12  ;;  %v189_v13 = vsub.f32 %v2270_v11, %v187_v12  ;;  %vm204_vm1 = vcmp.eq.f32.partialorder %v2270_v11, %v2234_v0  ;;  %vm205_vm2 = vcmp.eq.f32.partialorder %v2270_v11, %v2236_v1 }
  0x5d   : > { %vm2284_vm4 = vmxor %vm204_vm1, %vm2083_vm3  ;;  %v198_v19 = vsub.f32 %v2270_v11, %v2234_v0  ;;  %v200_v20 = vsub.f32 %v2270_v11, %v2236_v1  ;;  %v202_v21 = vsub.f32 %v2270_v11, %v2238_v2  ;;  %v190_v36 = vsel %vm188_vm0, 1.0, %v2270_v11 }
  0x5e   : > { %v192_v14 = vsel %vm188_vm0, 1.0, %v189_v13  ;;  %vm207_vm5 = vmand %vm205_vm2, %vm2284_vm4  ;;  %v285_v57 = vadd.f32 %v284_v52, %v283_v51 }
  0x5f   : > { %1662 = vrcp.f32 %v192_v14  ;;  %vm208_vm6 = vmxor %vm207_vm5, %vm2083_vm3 }
  0x60   : > { %vm209_vm7 = vmand %vm208_vm6, %vm2284_vm4  ;;  %1664 = vrcp.f32 %v190_v36  ;;  %v287_v63 = vmul.f32 %v286_v59, %v285_v57 }
  0x62   : > { %v298_v17 = vadd.f32 %v297_v7, %v287_v63 }
  0x6c   : > { %v1663_v15 = vpop.eup %1662 }
  0x6d   : > { %v194_v16 = vmul.f32 %v1663_v15, %v192_v14  ;;  %v1665_v48 = vpop.eup %1664 }
  0x6e   : > { %v197_v53 = vmul.f32 %v1665_v48, %v189_v13  ;;  %v294_v13 = vadd.f32 %v293_v3, %v287_v63 }
  0x6f   : > { %v195_v18 = vsub.f32 2.0, %v194_v16 }
  0x70   : > { %v240_v56 = vsub.f32 1.0, %v197_v53 }
  0x71   : > { %v196_v22 = vmul.f32 %v1663_v15, %v195_v18  ;;  %v290_v18 = vadd.f32 %v289_v8, %v287_v63 }
  0x72   : > { %v241_v62 = vmul.f32 %v240_v56, %v2270_v11 }
  0x73   : > { %v199_v23 = vmul.f32 %v198_v19, %v196_v22  ;;  %v201_v24 = vmul.f32 %v200_v20, %v196_v22  ;;  %v203_v25 = vmul.f32 %v202_v21, %v196_v22  ;;  %v1154_v22 = vstv %s1153_s11 }
  0x74   : > { %v242_v9 = vmax.f32 %v241_v62, 0.0  ;;  %vm1155_vm15 = vcmp.ne.s32.totalorder %v1154_v22, 0 }
  0x75   : > { %v210_v26 = vsub.f32 %v203_v25, %v201_v24  ;;  %v212_v27 = vadd.f32 2.0, %v199_v23  ;;  %v216_v28 = vadd.f32 4.0, %v201_v24  ;;  %v1167_v24 = vstv %s1166_s13 }
  0x76   : > { %v243_v19 = vmin.f32 %v242_v9, 1.0 }
  0x77   : > { %v211_v29 = vsel %vm204_vm1, %v210_v26, 0.0  ;;  %v213_v30 = vsub.f32 %v212_v27, %v203_v25  ;;  %v217_v31 = vsub.f32 %v216_v28, %v199_v23  ;;  %v295_v23 = vmax.f32 %v294_v13, 0.0 }
  0x78   : > { %v299_v27 = vmax.f32 %v298_v17, 0.0  ;;  %v291_v28 = vmax.f32 %v290_v18, 0.0  ;;  %vm1168_vm1 = vcmp.ne.s32.totalorder %v1167_v24, 0 }
  0x79   : > { %v214_v32 = vsel %vm207_vm5, %v213_v30, 0.0  ;;  %v218_v33 = vsel %vm209_vm7, %v217_v31, 0.0 }
  0x7a   : > { %v215_v34 = vadd.f32 %v214_v32, %v211_v29 }
  0x7c   : > { %v219_v35 = vadd.f32 %v218_v33, %v215_v34  ;;  %v296_v34 = vmin.f32 %v295_v23, 1.0 }
  0x7e   : > { %v220_v37 = vmul.f32 0.16666667, %v219_v35 }
  0x80   : > { %v221_v38 = vadd.f32 1.0, %v220_v37 }
  0x82   : > { %v222_v39 = vfloor.f32 %v221_v38 }
  0x84   : > { %v223_v40 = vsub.f32 %v221_v38, %v222_v39  ;;  %v300_v38 = vmin.f32 %v299_v27, 1.0 }
  0x86   : > { %vm224_vm8 = vcmp.ge.f32.partialorder %v223_v40, 1.0  ;;  %v1077_v41 = vadd.f32 -1.0, %v223_v40 }
  0x88   : > { %v226_v43 = vsel %vm224_vm8, %v1077_v41, %v223_v40 }
  0x89   : > { %v228_v44 = vadd.f32 %v227_v42, %v226_v43 }
  0x8b   : > { %v229_v45 = vfloor.f32 %v228_v44 }
  0x8d   : > { %v230_v49 = vsub.f32 %v228_v44, %v229_v45  ;;  %v292_v45 = vmin.f32 %v291_v28, 1.0 }
  0x8f   : > { %vm231_vm9 = vcmp.ge.f32.partialorder %v230_v49, 1.0  ;;  %v1078_v50 = vadd.f32 -1.0, %v230_v49 }
  0x91   : > { %v233_v54 = vsel %vm231_vm9, %v1078_v50, %v230_v49 }
  0x92   : > { %v234_v55 = vmul.f32 6.0, %v233_v54 }
  0x94   : > { %v235_v58 = vfloor.f32 %v234_v55 }
  0x96   : > { %v236_v61 = vsub.f32 %v234_v55, %v235_v58  ;;  %v1079_v4 = vadd.f32 -6.0, %v235_v58  ;;  %vm237_vm10 = vcmp.ge.f32.partialorder %v235_v58, 6.0 }
  0x98   : > { %v244_v5 = vmul.f32 %v236_v61, %v197_v53  ;;  %v249_v6 = vsub.f32 1.0, %v236_v61  ;;  %v239_v14 = vsel %vm237_vm10, %v1079_v4, %v235_v58 }
  0x99   : > { %vm258_vm11 = vcmp.eq.f32.partialorder %v239_v14, 3.0  ;;  %vm259_vm12 = vcmp.eq.f32.partialorder %v239_v14, 4.0  ;;  %vm257_vm13 = vcmp.eq.f32.partialorder %v239_v14, 2.0  ;;  %vm256_vm14 = vcmp.eq.f32.partialorder %v239_v14, 1.0 }
  0x9a   : > { %v245_v10 = vsub.f32 1.0, %v244_v5  ;;  %v250_v12 = vmul.f32 %v249_v6, %v197_v53  ;;  %vm255_vm0 = vcmp.eq.f32.partialorder %v239_v14, 0.0 }
  0x9c   : > { %v246_v15 = vmul.f32 %v245_v10, %v2270_v11  ;;  %v251_v16 = vsub.f32 1.0, %v250_v12 }
  0x9e   : > { %v247_v20 = vmax.f32 %v246_v15, 0.0  ;;  %v252_v21 = vmul.f32 %v251_v16, %v2270_v11 }
  0xa0   : > { %v248_v25 = vmin.f32 %v247_v20, 1.0  ;;  %v253_v26 = vmax.f32 %v252_v21, 0.0 }
  0xa2   : > { %v254_v29 = vmin.f32 %v253_v26, 1.0  ;;  %v265_v30 = vsel %vm258_vm11, %v248_v25, %v243_v19  ;;  %v269_v31 = vsel %vm259_vm12, %v2270_v11, %v248_v25 }
  0xa3   : > { %v266_v32 = vsel %vm257_vm13, %v2270_v11, %v265_v30  ;;  %v270_v33 = vsel %vm258_vm11, %v2270_v11, %v269_v31 }
  0xa4   : > { %v260_v35 = vsel %vm259_vm12, %v254_v29, %v2270_v11  ;;  %v267_v36 = vsel %vm256_vm14, %v2270_v11, %v266_v32  ;;  %v271_v37 = vsel %vm257_vm13, %v254_v29, %v270_v33 }
  0xa5   : > { %v261_v39 = vsel %vm258_vm11, %v243_v19, %v260_v35  ;;  %v268_v40 = vsel %vm255_vm0, %v254_v29, %v267_v36  ;;  %v272_v41 = vsel %vm256_vm14, %v243_v19, %v271_v37 }
  0xa6   : > { %v262_v42 = vsel %vm257_vm13, %v243_v19, %v261_v39  ;;  %v273_v43 = vsel %vm255_vm0, %v243_v19, %v272_v41  ;;  %v1160_v44 = vsel %vm1155_vm15, %v268_v40, 0 }
  0xa7   : > { %v263_v46 = vsel %vm256_vm14, %v248_v25, %v262_v42  ;;  %v1164_v47 = vsel %vm1155_vm15, %v273_v43, 0  ;;  %v1173_v7 = vsel %vm1168_vm1, %v296_v34, %v1160_v44  }
  0xa8   : > { %v264_v48 = vsel %vm255_vm0, %v2270_v11, %v263_v46  ;;  %v1177_v6 = vsel %vm1168_vm1, %v300_v38, %v1164_v47  }
  0xa9   : > { %v1156_v49 = vsel %vm1155_vm15, %v264_v48, 0 }
  0xaa   : > { %v1169_v8 = vsel %vm1168_vm1, %v292_v45, %v1156_v49  }
  0xab PF: > { %v1946_v3 = vmov %v1936_v6   ;;  %v1950_v4 = vmov %v1940_v7   ;;  %v1954_v5 = vmov %v1944_v8   ;;  %309 = sbr.rel (%p2255_p4) target bundleno = 393 (0x189), region = 48  ;;  %s327_s14 = ssub.f32 (!%p2255_p4), 1.0, %s2224_s17  ;;  %v1944_v8 = vphi %v2263_v8, %v1169_v8   ;;  %v1940_v7 = vphi %v2261_v7, %v1173_v7   ;;  %v1936_v6 = vphi %v2259_v6, %v1177_v6  }
  0xb0   : > { %v310_v11 = vmul.f32 0.2989, %v2234_v0  ;;  %v311_v50 = vmul.f32 0.587, %v2236_v1  ;;  %v313_v51 = vmul.f32 0.114, %v2238_v2  ;;  %v329_v62 = vstv %s2224_s17 }
  0xb1   : > { %vm315_vm2 = vcmask 1041408   ;;  %v330_v63 = vmul.f32 %v329_v62, %v2234_v0  ;;  %v335_v3 = vmul.f32 %v2236_v1, %v329_v62  ;;  %v339_v4 = vmul.f32 %v2238_v2, %v329_v62 }
  0xb2   : > { %v312_v52 = vadd.f32 %v311_v50, %v310_v11 }
  0xb4   : > { %v314_v53 = vadd.f32 %v313_v51, %v312_v52 }
  0xb6   : > { %v316_v54 = vsel %vm315_vm2, %v314_v53, 0.0 }
  0xb7   : > { %317 = vadd.xlane.f32.xlu0 %v316_v54 }
 0x140   : > { %v318_v55 = vpop.xlane.xlu0 %317 }
 0x141   : > { %v319_v56 = vrot.slane %v318_v55, 4 }
 0x143   : > { %v320_v57 = vadd.f32 %v319_v56, %v318_v55 }
 0x145   : > { %v321_v58 = vrot.slane %v320_v57, 2 }
 0x147   : > { %v322_v59 = vadd.f32 %v321_v58, %v320_v57 }
 0x149   : > { %v323_v60 = vrot.slane %v322_v59, 1 }
 0x14b   : > { %v324_v61 = vadd.f32 %v323_v60, %v322_v59 }
 0x14d   : > { %1141 = vpush %v324_v61 }
 0x17e   : > { %s1142_s26 = spop %1141 }
 0x17f   : > { %s326_s4 = smul.f32 0.00390625, %s1142_s26 }
 0x181   : > { %s328_s9 = smul.f32 %s327_s14, %s326_s4 }
 0x183   : > { %v331_v5 = vstv %s328_s9 }
 0x184   : > { %v332_v6 = vadd.f32 %v331_v5, %v330_v63  ;;  %v336_v7 = vadd.f32 %v335_v3, %v331_v5  ;;  %v340_v8 = vadd.f32 %v339_v4, %v331_v5 }
 0x186   : > { %v333_v9 = vmax.f32 %v332_v6, 0.0  ;;  %v337_v10 = vmax.f32 %v336_v7, 0.0  ;;  %v341_v12 = vmax.f32 %v340_v8, 0.0 }
 0x188   : > { %v334_v5 = vmin.f32 %v333_v9, 1.0   ;;  %v338_v4 = vmin.f32 %v337_v10, 1.0   ;;  %v342_v3 = vmin.f32 %v341_v12, 1.0  }
 0x189 PF: > { %v2384_v13 = vstv %s2217_s10  ;;  %s1179_s6 = scalar_select %p1072_p12, 1, 0  ;;  %v2408_v26 = vmov 0   ;;  %v1956_v5 = vphi %v1954_v5, %v334_v5   ;;  %v1952_v4 = vphi %v1950_v4, %v338_v4   ;;  %v1948_v3 = vphi %v1946_v3, %v342_v3   ;;  %v1968_v5 = vphi %v2250_v5, %v1956_v5   ;;  %v1964_v4 = vphi %v2248_v4, %v1952_v4   ;;  %v1960_v3 = vphi %v2246_v3, %v1948_v3  }
 0x18a   : > { %v353_v14 = vmul.f32 %v2384_v13, %v2234_v0  ;;  %v356_v15 = vmul.f32 %v2236_v1, %v2384_v13  ;;  %v359_v16 = vmul.f32 %v2238_v2, %v2384_v13  ;;  %s365_s12 = sld [smem:[#allocation3 + %s2219_s15]]  ;;  %v2404_v1 = vmov 0  }
 0x18b   : > { %v1180_v17 = vstv %s1179_s6  ;;  %v2406_v2 = vmov 0  }
 0x18c   : > { %v354_v18 = vmax.f32 %v353_v14, 0.0  ;;  %v357_v19 = vmax.f32 %v356_v15, 0.0  ;;  %v360_v20 = vmax.f32 %v359_v16, 0.0  ;;  %vm1181_vm3 = vcmp.ne.s32.totalorder %v1180_v17, 0 }
 0x18e   : > { %v355_v21 = vmin.f32 %v354_v18, 1.0  ;;  %v358_v22 = vmin.f32 %v357_v19, 1.0  ;;  %v361_v23 = vmin.f32 %v360_v20, 1.0 }
 0x190   : > { %v2395_v24 = vsel %vm1181_vm3, %v355_v21, %v1968_v5  ;;  %v2397_v25 = vsel %vm1181_vm3, %v358_v22, %v1964_v4  ;;  %v2399_v0 = vsel %vm1181_vm3, %v361_v23, %v1960_v3  ;;  %p366_p9 = scmp.gt.s32.totalorder %s365_s12, 0  ;;  %p1080_p13 = scmp.lt.s32.totalorder %s365_s12, 3 }
 0x192   : > { %s2953_s12 = smov (!%p366_p9, %s365_s12), 0 }
 0x193   : > { %s2955_s12 = smov (!%p1080_p13, %s2953_s12), 3 }
 0x194   : > { %p1085_p1 = scmp.eq.s32.totalorder %s2955_s12, 0 }
 0x195   : > { %s1086_s10 = sadd.s32 (!%p1085_p1), 4294967295, %s2955_s12 }
 0x196   : > { %373 = sbr.rel (%p1085_p1) target bundleno = 721 (0x2d1), region = 56  ;;  %p2413_p0 = scmp.ne.s32.totalorder (!%p1085_p1), %s1086_s10, 0 }
 0x197   : > { %p1087_p2 = scmp.eq.s32.totalorder (!%p1085_p1), %s1086_s10, 0 }
 0x19b   : > { %v2417_v27 = vmov 0   ;;  %v2419_v28 = vmov 0   ;;  %v2421_v29 = vmov 0   ;;  %378 = sbr.rel (%p1087_p2) target bundleno = 499 (0x1f3), region = 60  ;;  %s480_s29 = ssub.f32 (!%p1087_p2), 1.0, %s2227_s1 }
 0x19c   : > { %s1088_s7 = sadd.s32 (!%p1087_p2), 4294967294, %s2955_s12 }
 0x19d   : > { %p2469_p3 = scmp.ne.s32.totalorder (!%p1087_p2), %s1088_s7, 0  ;;  %p2474_p6 = scmp.eq.s32.totalorder (!%p1087_p2), %s1088_s7, 0 }
 0x1a0   : > { %v384_v30 = vmax.f32 %v2395_v24, %v2397_v25  ;;  %v386_v31 = vmin.f32 %v2395_v24, %v2397_v25  ;;  %vm2084_vm7 = vmmov 1   ;;  %v427_v62 = vstv %s2232_s24  ;;  %s1192_s13 = scalar_select %p2469_p3, 1, 0 }
 0x1a1   : > { %v481_v5 = vmul.f32 0.2989, %v2395_v24  ;;  %v482_v6 = vmul.f32 0.587, %v2397_v25  ;;  %v484_v12 = vmul.f32 0.114, %v2399_v0  ;;  %v486_v20 = vstv %s480_s29 }
 0x1a2   : > { %v2428_v32 = vmax.f32 %v384_v30, %v2399_v0  ;;  %v387_v33 = vmin.f32 %v386_v31, %v2399_v0  ;;  %v488_v21 = vstv %s2227_s1  ;;  %s1205_s14 = scalar_select %p2474_p6, 1, 0 }
 0x1a3   : > { %v483_v10 = vadd.f32 %v482_v6, %v481_v5  ;;  %v493_v2 = vmul.f32 %v2397_v25, %v488_v21  ;;  %v497_v29 = vmul.f32 %v2399_v0, %v488_v21  ;;  %v489_v30 = vmul.f32 %v2395_v24, %v488_v21 }
 0x1a4   : > { %vm388_vm4 = vcmp.eq.f32.partialorder %v2428_v32, %v387_v33  ;;  %v389_v34 = vsub.f32 %v2428_v32, %v387_v33  ;;  %vm404_vm5 = vcmp.eq.f32.partialorder %v2428_v32, %v2395_v24  ;;  %vm405_vm6 = vcmp.eq.f32.partialorder %v2428_v32, %v2397_v25 }
 0x1a5   : > { %vm2442_vm8 = vmxor %vm404_vm5, %vm2084_vm7  ;;  %v398_v40 = vsub.f32 %v2428_v32, %v2395_v24  ;;  %v400_v41 = vsub.f32 %v2428_v32, %v2397_v25  ;;  %v402_v42 = vsub.f32 %v2428_v32, %v2399_v0  ;;  %v390_v56 = vsel %vm388_vm4, 1.0, %v2428_v32 }
 0x1a6   : > { %v392_v35 = vsel %vm388_vm4, 1.0, %v389_v34  ;;  %vm407_vm9 = vmand %vm405_vm6, %vm2442_vm8  ;;  %v485_v18 = vadd.f32 %v484_v12, %v483_v10 }
 0x1a7   : > { %1666 = vrcp.f32 %v392_v35  ;;  %vm408_vm10 = vmxor %vm407_vm9, %vm2084_vm7 }
 0x1a8   : > { %vm409_vm11 = vmand %vm408_vm10, %vm2442_vm8  ;;  %1668 = vrcp.f32 %v390_v56  ;;  %v487_v1 = vmul.f32 %v486_v20, %v485_v18 }
 0x1b4   : > { %v1667_v36 = vpop.eup %1666 }
 0x1b5   : > { %v394_v37 = vmul.f32 %v1667_v36, %v392_v35  ;;  %v1669_v7 = vpop.eup %1668  ;;  %v494_v35 = vadd.f32 %v493_v2, %v487_v1 }
 0x1b6   : > { %v397_v14 = vmul.f32 %v1669_v7, %v389_v34 }
 0x1b7   : > { %v395_v39 = vsub.f32 2.0, %v394_v37 }
 0x1b8   : > { %v440_v17 = vsub.f32 1.0, %v397_v14 }
 0x1b9   : > { %v396_v43 = vmul.f32 %v1667_v36, %v395_v39  ;;  %v498_v39 = vadd.f32 %v497_v29, %v487_v1 }
 0x1ba   : > { %v441_v23 = vmul.f32 %v440_v17, %v2428_v32 }
 0x1bb   : > { %v399_v44 = vmul.f32 %v398_v40, %v396_v43  ;;  %v401_v45 = vmul.f32 %v400_v41, %v396_v43  ;;  %v403_v46 = vmul.f32 %v402_v42, %v396_v43  ;;  %v490_v40 = vadd.f32 %v489_v30, %v487_v1 }
 0x1bc   : > { %v442_v31 = vmax.f32 %v441_v23, 0.0 }
 0x1bd   : > { %v410_v47 = vsub.f32 %v403_v46, %v401_v45  ;;  %v412_v48 = vadd.f32 2.0, %v399_v44  ;;  %v416_v49 = vadd.f32 4.0, %v401_v45  ;;  %v495_v45 = vmax.f32 %v494_v35, 0.0 }
 0x1be   : > { %v443_v41 = vmin.f32 %v442_v31, 1.0 }
 0x1bf   : > { %v411_v11 = vsel %vm404_vm5, %v410_v47, 0.0  ;;  %v413_v50 = vsub.f32 %v412_v48, %v403_v46  ;;  %v417_v51 = vsub.f32 %v416_v49, %v399_v44  ;;  %v1193_v44 = vstv %s1192_s13 }
 0x1c0   : > { %v1206_v46 = vstv %s1205_s14  ;;  %v499_v49 = vmax.f32 %v498_v39, 0.0  ;;  %vm1194_vm3 = vcmp.ne.s32.totalorder %v1193_v44, 0 }
 0x1c1   : > { %v414_v52 = vsel %vm407_vm9, %v413_v50, 0.0  ;;  %v418_v53 = vsel %vm409_vm11, %v417_v51, 0.0  ;;  %vm1207_vm5 = vcmp.ne.s32.totalorder %v1206_v46, 0 }
 0x1c2   : > { %v415_v54 = vadd.f32 %v414_v52, %v411_v11  ;;  %v491_v11 = vmax.f32 %v490_v40, 0.0 }
 0x1c4   : > { %v419_v55 = vadd.f32 %v418_v53, %v415_v54  ;;  %v492_v5 = vmin.f32 %v491_v11, 1.0 }
 0x1c6   : > { %v420_v57 = vmul.f32 0.16666667, %v419_v55  ;;  %v496_v55 = vmin.f32 %v495_v45, 1.0 }
 0x1c8   : > { %v421_v58 = vadd.f32 1.0, %v420_v57 }
 0x1ca   : > { %v422_v59 = vfloor.f32 %v421_v58 }
 0x1cc   : > { %v423_v60 = vsub.f32 %v421_v58, %v422_v59  ;;  %v500_v59 = vmin.f32 %v499_v49, 1.0 }
 0x1ce   : > { %vm424_vm12 = vcmp.ge.f32.partialorder %v423_v60, 1.0  ;;  %v1090_v61 = vadd.f32 -1.0, %v423_v60 }
 0x1d0   : > { %v426_v63 = vsel %vm424_vm12, %v1090_v61, %v423_v60 }
 0x1d1   : > { %v428_v3 = vadd.f32 %v427_v62, %v426_v63 }
 0x1d3   : > { %v429_v4 = vfloor.f32 %v428_v3 }
 0x1d5   : > { %v430_v8 = vsub.f32 %v428_v3, %v429_v4 }
 0x1d7   : > { %vm431_vm13 = vcmp.ge.f32.partialorder %v430_v8, 1.0  ;;  %v1091_v9 = vadd.f32 -1.0, %v430_v8 }
 0x1d9   : > { %v433_v15 = vsel %vm431_vm13, %v1091_v9, %v430_v8 }
 0x1da   : > { %v434_v16 = vmul.f32 6.0, %v433_v15 }
 0x1dc   : > { %v435_v19 = vfloor.f32 %v434_v16 }
 0x1de   : > { %v436_v22 = vsub.f32 %v434_v16, %v435_v19  ;;  %v1092_v26 = vadd.f32 -6.0, %v435_v19  ;;  %vm437_vm14 = vcmp.ge.f32.partialorder %v435_v19, 6.0 }
 0x1e0   : > { %v444_v27 = vmul.f32 %v436_v22, %v397_v14  ;;  %v449_v28 = vsub.f32 1.0, %v436_v22  ;;  %v439_v36 = vsel %vm437_vm14, %v1092_v26, %v435_v19 }
 0x1e1   : > { %vm458_vm15 = vcmp.eq.f32.partialorder %v439_v36, 3.0  ;;  %vm459_vm0 = vcmp.eq.f32.partialorder %v439_v36, 4.0  ;;  %vm457_vm1 = vcmp.eq.f32.partialorder %v439_v36, 2.0  ;;  %vm456_vm2 = vcmp.eq.f32.partialorder %v439_v36, 1.0 }
 0x1e2   : > { %v445_v33 = vsub.f32 1.0, %v444_v27  ;;  %v450_v34 = vmul.f32 %v449_v28, %v397_v14  ;;  %vm455_vm4 = vcmp.eq.f32.partialorder %v439_v36, 0.0 }
 0x1e4   : > { %v446_v37 = vmul.f32 %v445_v33, %v2428_v32  ;;  %v451_v38 = vsub.f32 1.0, %v450_v34 }
 0x1e6   : > { %v447_v42 = vmax.f32 %v446_v37, 0.0  ;;  %v452_v43 = vmul.f32 %v451_v38, %v2428_v32 }
 0x1e8   : > { %v448_v47 = vmin.f32 %v447_v42, 1.0  ;;  %v453_v48 = vmax.f32 %v452_v43, 0.0 }
 0x1ea   : > { %v454_v50 = vmin.f32 %v453_v48, 1.0  ;;  %v465_v51 = vsel %vm458_vm15, %v448_v47, %v443_v41  ;;  %v469_v52 = vsel %vm459_vm0, %v2428_v32, %v448_v47 }
 0x1eb   : > { %v466_v53 = vsel %vm457_vm1, %v2428_v32, %v465_v51  ;;  %v470_v54 = vsel %vm458_vm15, %v2428_v32, %v469_v52 }
 0x1ec   : > { %v460_v56 = vsel %vm459_vm0, %v454_v50, %v2428_v32  ;;  %v467_v57 = vsel %vm456_vm2, %v2428_v32, %v466_v53  ;;  %v471_v58 = vsel %vm457_vm1, %v454_v50, %v470_v54 }
 0x1ed   : > { %v461_v60 = vsel %vm458_vm15, %v443_v41, %v460_v56  ;;  %v468_v61 = vsel %vm455_vm4, %v454_v50, %v467_v57  ;;  %v472_v62 = vsel %vm456_vm2, %v443_v41, %v471_v58 }
 0x1ee   : > { %v462_v63 = vsel %vm457_vm1, %v443_v41, %v461_v60  ;;  %v473_v3 = vsel %vm455_vm4, %v443_v41, %v472_v62  ;;  %v1199_v4 = vsel %vm1194_vm3, %v468_v61, 0 }
 0x1ef   : > { %v463_v6 = vsel %vm456_vm2, %v448_v47, %v462_v63  ;;  %v1203_v7 = vsel %vm1194_vm3, %v473_v3, 0  ;;  %v1212_v28 = vsel %vm1207_vm5, %v496_v55, %v1199_v4  }
 0x1f0   : > { %v464_v8 = vsel %vm455_vm4, %v2428_v32, %v463_v6  ;;  %v1216_v27 = vsel %vm1207_vm5, %v500_v59, %v1203_v7  }
 0x1f1   : > { %v1195_v9 = vsel %vm1194_vm3, %v464_v8, 0 }
 0x1f2   : > { %v1208_v29 = vsel %vm1207_vm5, %v492_v5, %v1195_v9  }
 0x1f3 PF: > { %v1982_v1 = vmov %v1972_v27   ;;  %v1986_v2 = vmov %v1976_v28   ;;  %v1990_v26 = vmov %v1980_v29   ;;  %509 = sbr.rel (%p2413_p0) target bundleno = 721 (0x2d1), region = 72  ;;  %s527_s26 = ssub.f32 (!%p2413_p0), 1.0, %s2224_s17  ;;  %v1980_v29 = vphi %v2421_v29, %v1208_v29   ;;  %v1976_v28 = vphi %v2419_v28, %v1212_v28   ;;  %v1972_v27 = vphi %v2417_v27, %v1216_v27  }
 0x1f8   : > { %v510_v32 = vmul.f32 0.2989, %v2395_v24  ;;  %v511_v10 = vmul.f32 0.587, %v2397_v25  ;;  %v513_v12 = vmul.f32 0.114, %v2399_v0  ;;  %v529_v1 = vstv %s2224_s17 }
 0x1f9   : > { %vm515_vm6 = vcmask 1041408   ;;  %v530_v2 = vmul.f32 %v2395_v24, %v529_v1  ;;  %v535_v26 = vmul.f32 %v2397_v25, %v529_v1  ;;  %v539_v27 = vmul.f32 %v2399_v0, %v529_v1 }
 0x1fa   : > { %v512_v14 = vadd.f32 %v511_v10, %v510_v32 }
 0x1fc   : > { %v514_v15 = vadd.f32 %v513_v12, %v512_v14 }
 0x1fe   : > { %v516_v16 = vsel %vm515_vm6, %v514_v15, 0.0 }
 0x1ff   : > { %517 = vadd.xlane.f32.xlu0 %v516_v16 }
 0x288   : > { %v518_v17 = vpop.xlane.xlu0 %517 }
 0x289   : > { %v519_v18 = vrot.slane %v518_v17, 4 }
 0x28b   : > { %v520_v19 = vadd.f32 %v519_v18, %v518_v17 }
 0x28d   : > { %v521_v20 = vrot.slane %v520_v19, 2 }
 0x28f   : > { %v522_v21 = vadd.f32 %v521_v20, %v520_v19 }
 0x291   : > { %v523_v22 = vrot.slane %v522_v21, 1 }
 0x293   : > { %v524_v23 = vadd.f32 %v523_v22, %v522_v21 }
 0x295   : > { %1143 = vpush %v524_v23 }
 0x2c6   : > { %s1144_s4 = spop %1143 }
 0x2c7   : > { %s526_s9 = smul.f32 0.00390625, %s1144_s4 }
 0x2c9   : > { %s528_s6 = smul.f32 %s527_s26, %s526_s9 }
 0x2cb   : > { %v531_v28 = vstv %s528_s6 }
 0x2cc   : > { %v532_v29 = vadd.f32 %v531_v28, %v530_v2  ;;  %v536_v30 = vadd.f32 %v535_v26, %v531_v28  ;;  %v540_v31 = vadd.f32 %v539_v27, %v531_v28 }
 0x2ce   : > { %v533_v33 = vmax.f32 %v532_v29, 0.0  ;;  %v537_v34 = vmax.f32 %v536_v30, 0.0  ;;  %v541_v35 = vmax.f32 %v540_v31, 0.0 }
 0x2d0   : > { %v534_v26 = vmin.f32 %v533_v33, 1.0   ;;  %v538_v2 = vmin.f32 %v537_v34, 1.0   ;;  %v542_v1 = vmin.f32 %v541_v35, 1.0  }
 0x2d1 PF: > { %v553_v36 = vmul.f32 %v2395_v24, %v2384_v13  ;;  %v556_v37 = vmul.f32 %v2397_v25, %v2384_v13  ;;  %v559_v38 = vmul.f32 %v2399_v0, %v2384_v13  ;;  %s1218_s10 = scalar_select %p1085_p1, 1, 0  ;;  %v2559_v25 = vmov 0   ;;  %v1992_v26 = vphi %v1990_v26, %v534_v26   ;;  %v1988_v2 = vphi %v1986_v2, %v538_v2   ;;  %v1984_v1 = vphi %v1982_v1, %v542_v1   ;;  %v2004_v26 = vphi %v2408_v26, %v1992_v26   ;;  %v2000_v2 = vphi %v2406_v2, %v1988_v2   ;;  %v1996_v1 = vphi %v2404_v1, %v1984_v1  }
 0x2d2   : > { %s565_s15 = sld [smem:[#allocation3 + %s2221_s16]]  ;;  %v2561_v0 = vmov 0   ;;  %v2563_v48 = vmov 0  }
 0x2d3   : > { %v554_v39 = vmax.f32 %v553_v36, 0.0  ;;  %v557_v40 = vmax.f32 %v556_v37, 0.0  ;;  %v560_v41 = vmax.f32 %v559_v38, 0.0  ;;  %v1219_v42 = vstv %s1218_s10 }
 0x2d4   : > { %vm1220_vm7 = vcmp.ne.s32.totalorder %v1219_v42, 0 }
 0x2d5   : > { %v555_v43 = vmin.f32 %v554_v39, 1.0  ;;  %v558_v44 = vmin.f32 %v557_v40, 1.0  ;;  %v561_v45 = vmin.f32 %v560_v41, 1.0 }
 0x2d7   : > { %v2550_v46 = vsel %vm1220_vm7, %v555_v43, %v2004_v26  ;;  %v2552_v24 = vsel %vm1220_vm7, %v558_v44, %v2000_v2  ;;  %v2554_v47 = vsel %vm1220_vm7, %v561_v45, %v1996_v1 }
 0x2d8   : > { %p566_p10 = scmp.gt.s32.totalorder %s565_s15, 0  ;;  %p1093_p11 = scmp.lt.s32.totalorder %s565_s15, 3 }
 0x2da   : > { %s2957_s15 = smov (!%p566_p10, %s565_s15), 0 }
 0x2db   : > { %s2959_s15 = smov (!%p1093_p11, %s2957_s15), 3 }
 0x2dc   : > { %p1098_p12 = scmp.eq.s32.totalorder %s2959_s15, 0 }
 0x2dd   : > { %s1099_s16 = sadd.s32 (!%p1098_p12), 4294967295, %s2959_s15 }
 0x2de   : > { %573 = sbr.rel (%p1098_p12) target bundleno = 1049 (0x419), region = 80  ;;  %p2568_p4 = scmp.ne.s32.totalorder (!%p1098_p12), %s1099_s16, 0 }
 0x2df   : > { %p1100_p5 = scmp.eq.s32.totalorder (!%p1098_p12), %s1099_s16, 0 }
 0x2e3   : > { %v2572_v49 = vmov 0   ;;  %v2574_v11 = vmov 0   ;;  %v2576_v50 = vmov 0   ;;  %578 = sbr.rel (%p1100_p5) target bundleno = 827 (0x33b), region = 84  ;;  %s680_s29 = ssub.f32 (!%p1100_p5), 1.0, %s2227_s1 }
 0x2e4   : > { %s1101_s7 = sadd.s32 (!%p1100_p5), 4294967294, %s2959_s15 }
 0x2e5   : > { %p2624_p7 = scmp.ne.s32.totalorder (!%p1100_p5), %s1101_s7, 0  ;;  %p2629_p8 = scmp.eq.s32.totalorder (!%p1100_p5), %s1101_s7, 0 }
 0x2e8   : > { %v584_v51 = vmax.f32 %v2550_v46, %v2552_v24  ;;  %v586_v52 = vmin.f32 %v2550_v46, %v2552_v24  ;;  %vm2085_vm11 = vmmov 1   ;;  %v627_v1 = vstv %s2232_s24  ;;  %s1231_s13 = scalar_select %p2624_p7, 1, 0 }
 0x2e9   : > { %v681_v28 = vmul.f32 0.2989, %v2550_v46  ;;  %v682_v29 = vmul.f32 0.587, %v2552_v24  ;;  %v684_v35 = vmul.f32 0.114, %v2554_v47  ;;  %v686_v42 = vstv %s680_s29 }
 0x2ea   : > { %v2583_v53 = vmax.f32 %v584_v51, %v2554_v47  ;;  %v587_v54 = vmin.f32 %v586_v52, %v2554_v47  ;;  %v688_v43 = vstv %s2227_s1  ;;  %s1244_s14 = scalar_select %p2629_p8, 1, 0 }
 0x2eb   : > { %v683_v34 = vadd.f32 %v682_v29, %v681_v28  ;;  %v693_v0 = vmul.f32 %v2552_v24, %v688_v43  ;;  %v697_v50 = vmul.f32 %v2554_v47, %v688_v43  ;;  %v689_v51 = vmul.f32 %v2550_v46, %v688_v43 }
 0x2ec   : > { %vm588_vm8 = vcmp.eq.f32.partialorder %v2583_v53, %v587_v54  ;;  %v589_v55 = vsub.f32 %v2583_v53, %v587_v54  ;;  %vm604_vm9 = vcmp.eq.f32.partialorder %v2583_v53, %v2550_v46  ;;  %vm605_vm10 = vcmp.eq.f32.partialorder %v2583_v53, %v2552_v24 }
 0x2ed   : > { %vm2597_vm12 = vmxor %vm604_vm9, %vm2085_vm11  ;;  %v598_v61 = vsub.f32 %v2583_v53, %v2550_v46  ;;  %v600_v62 = vsub.f32 %v2583_v53, %v2552_v24  ;;  %v602_v63 = vsub.f32 %v2583_v53, %v2554_v47  ;;  %v590_v18 = vsel %vm588_vm8, 1.0, %v2583_v53 }
 0x2ee   : > { %v592_v56 = vsel %vm588_vm8, 1.0, %v589_v55  ;;  %vm607_vm13 = vmand %vm605_vm10, %vm2597_vm12  ;;  %v685_v40 = vadd.f32 %v684_v35, %v683_v34 }
 0x2ef   : > { %1670 = vrcp.f32 %v592_v56  ;;  %vm608_vm14 = vmxor %vm607_vm13, %vm2085_vm11 }
 0x2f0   : > { %vm609_vm15 = vmand %vm608_vm14, %vm2597_vm12  ;;  %1672 = vrcp.f32 %v590_v18  ;;  %v687_v25 = vmul.f32 %v686_v42, %v685_v40 }
 0x2fc   : > { %v1671_v57 = vpop.eup %1670 }
 0x2fd   : > { %v594_v58 = vmul.f32 %v1671_v57, %v592_v56  ;;  %v1673_v30 = vpop.eup %1672  ;;  %v694_v56 = vadd.f32 %v693_v0, %v687_v25 }
 0x2fe   : > { %v597_v36 = vmul.f32 %v1673_v30, %v589_v55 }
 0x2ff   : > { %v595_v60 = vsub.f32 2.0, %v594_v58 }
 0x300   : > { %v640_v39 = vsub.f32 1.0, %v597_v36 }
 0x301   : > { %v596_v3 = vmul.f32 %v1671_v57, %v595_v60  ;;  %v698_v60 = vadd.f32 %v697_v50, %v687_v25 }
 0x302   : > { %v641_v45 = vmul.f32 %v640_v39, %v2583_v53 }
 0x303   : > { %v599_v4 = vmul.f32 %v598_v61, %v596_v3  ;;  %v601_v5 = vmul.f32 %v600_v62, %v596_v3  ;;  %v603_v6 = vmul.f32 %v602_v63, %v596_v3  ;;  %v690_v61 = vadd.f32 %v689_v51, %v687_v25 }
 0x304   : > { %v642_v52 = vmax.f32 %v641_v45, 0.0 }
 0x305   : > { %v610_v7 = vsub.f32 %v603_v6, %v601_v5  ;;  %v612_v8 = vadd.f32 2.0, %v599_v4  ;;  %v616_v9 = vadd.f32 4.0, %v601_v5  ;;  %v695_v5 = vmax.f32 %v694_v56, 0.0 }
 0x306   : > { %v643_v62 = vmin.f32 %v642_v52, 1.0 }
 0x307   : > { %v611_v32 = vsel %vm604_vm9, %v610_v7, 0.0  ;;  %v613_v10 = vsub.f32 %v612_v8, %v603_v6  ;;  %v617_v12 = vsub.f32 %v616_v9, %v599_v4  ;;  %v1232_v4 = vstv %s1231_s13 }
 0x308   : > { %v1245_v6 = vstv %s1244_s14  ;;  %v699_v9 = vmax.f32 %v698_v60, 0.0  ;;  %vm1233_vm7 = vcmp.ne.s32.totalorder %v1232_v4, 0 }
 0x309   : > { %v614_v14 = vsel %vm607_vm13, %v613_v10, 0.0  ;;  %v618_v15 = vsel %vm609_vm15, %v617_v12, 0.0  ;;  %vm1246_vm9 = vcmp.ne.s32.totalorder %v1245_v6, 0 }
 0x30a   : > { %v615_v16 = vadd.f32 %v614_v14, %v611_v32  ;;  %v691_v32 = vmax.f32 %v690_v61, 0.0 }
 0x30c   : > { %v619_v17 = vadd.f32 %v618_v15, %v615_v16  ;;  %v692_v28 = vmin.f32 %v691_v32, 1.0 }
 0x30e   : > { %v620_v19 = vmul.f32 0.16666667, %v619_v17  ;;  %v696_v17 = vmin.f32 %v695_v5, 1.0 }
 0x310   : > { %v621_v20 = vadd.f32 1.0, %v620_v19 }
 0x312   : > { %v622_v21 = vfloor.f32 %v621_v20 }
 0x314   : > { %v623_v22 = vsub.f32 %v621_v20, %v622_v21  ;;  %v700_v21 = vmin.f32 %v699_v9, 1.0 }
 0x316   : > { %vm624_vm0 = vcmp.ge.f32.partialorder %v623_v22, 1.0  ;;  %v1103_v23 = vadd.f32 -1.0, %v623_v22 }
 0x318   : > { %v626_v2 = vsel %vm624_vm0, %v1103_v23, %v623_v22 }
 0x319   : > { %v628_v26 = vadd.f32 %v627_v1, %v626_v2 }
 0x31b   : > { %v629_v27 = vfloor.f32 %v628_v26 }
 0x31d   : > { %v630_v31 = vsub.f32 %v628_v26, %v629_v27 }
 0x31f   : > { %vm631_vm1 = vcmp.ge.f32.partialorder %v630_v31, 1.0  ;;  %v1104_v33 = vadd.f32 -1.0, %v630_v31 }
 0x321   : > { %v633_v37 = vsel %vm631_vm1, %v1104_v33, %v630_v31 }
 0x322   : > { %v634_v38 = vmul.f32 6.0, %v633_v37 }
 0x324   : > { %v635_v41 = vfloor.f32 %v634_v38 }
 0x326   : > { %v636_v44 = vsub.f32 %v634_v38, %v635_v41  ;;  %v1105_v48 = vadd.f32 -6.0, %v635_v41  ;;  %vm637_vm2 = vcmp.ge.f32.partialorder %v635_v41, 6.0 }
 0x328   : > { %v644_v49 = vmul.f32 %v636_v44, %v597_v36  ;;  %v649_v11 = vsub.f32 1.0, %v636_v44  ;;  %v639_v57 = vsel %vm637_vm2, %v1105_v48, %v635_v41 }
 0x329   : > { %vm658_vm3 = vcmp.eq.f32.partialorder %v639_v57, 3.0  ;;  %vm659_vm4 = vcmp.eq.f32.partialorder %v639_v57, 4.0  ;;  %vm657_vm5 = vcmp.eq.f32.partialorder %v639_v57, 2.0  ;;  %vm656_vm6 = vcmp.eq.f32.partialorder %v639_v57, 1.0 }
 0x32a   : > { %v645_v54 = vsub.f32 1.0, %v644_v49  ;;  %v650_v55 = vmul.f32 %v649_v11, %v597_v36  ;;  %vm655_vm8 = vcmp.eq.f32.partialorder %v639_v57, 0.0 }
 0x32c   : > { %v646_v58 = vmul.f32 %v645_v54, %v2583_v53  ;;  %v651_v59 = vsub.f32 1.0, %v650_v55 }
 0x32e   : > { %v647_v63 = vmax.f32 %v646_v58, 0.0  ;;  %v652_v3 = vmul.f32 %v651_v59, %v2583_v53 }
 0x330   : > { %v648_v7 = vmin.f32 %v647_v63, 1.0  ;;  %v653_v8 = vmax.f32 %v652_v3, 0.0 }
 0x332   : > { %v654_v10 = vmin.f32 %v653_v8, 1.0  ;;  %v665_v12 = vsel %vm658_vm3, %v648_v7, %v643_v62  ;;  %v669_v14 = vsel %vm659_vm4, %v2583_v53, %v648_v7 }
 0x333   : > { %v666_v15 = vsel %vm657_vm5, %v2583_v53, %v665_v12  ;;  %v670_v16 = vsel %vm658_vm3, %v2583_v53, %v669_v14 }
 0x334   : > { %v660_v18 = vsel %vm659_vm4, %v654_v10, %v2583_v53  ;;  %v667_v19 = vsel %vm656_vm6, %v2583_v53, %v666_v15  ;;  %v671_v20 = vsel %vm657_vm5, %v654_v10, %v670_v16 }
 0x335   : > { %v661_v22 = vsel %vm658_vm3, %v643_v62, %v660_v18  ;;  %v668_v23 = vsel %vm655_vm8, %v654_v10, %v667_v19  ;;  %v672_v1 = vsel %vm656_vm6, %v643_v62, %v671_v20 }
 0x336   : > { %v662_v2 = vsel %vm657_vm5, %v643_v62, %v661_v22  ;;  %v673_v26 = vsel %vm655_vm8, %v643_v62, %v672_v1  ;;  %v1238_v27 = vsel %vm1233_vm7, %v668_v23, 0 }
 0x337   : > { %v663_v29 = vsel %vm656_vm6, %v648_v7, %v662_v2  ;;  %v1242_v30 = vsel %vm1233_vm7, %v673_v26, 0  ;;  %v1251_v11 = vsel %vm1246_vm9, %v696_v17, %v1238_v27  }
 0x338   : > { %v664_v31 = vsel %vm655_vm8, %v2583_v53, %v663_v29  ;;  %v1255_v49 = vsel %vm1246_vm9, %v700_v21, %v1242_v30  }
 0x339   : > { %v1234_v33 = vsel %vm1233_vm7, %v664_v31, 0 }
 0x33a   : > { %v1247_v50 = vsel %vm1246_vm9, %v692_v28, %v1234_v33  }
 0x33b PF: > { %v2018_v25 = vmov %v2008_v49   ;;  %v2022_v0 = vmov %v2012_v11   ;;  %v2026_v48 = vmov %v2016_v50   ;;  %709 = sbr.rel (%p2568_p4) target bundleno = 1049 (0x419), region = 96  ;;  %s727_s26 = ssub.f32 (!%p2568_p4), 1.0, %s2224_s17  ;;  %v2016_v50 = vphi %v2576_v50, %v1247_v50   ;;  %v2012_v11 = vphi %v2574_v11, %v1251_v11   ;;  %v2008_v49 = vphi %v2572_v49, %v1255_v49  }
 0x340   : > { %v710_v53 = vmul.f32 0.2989, %v2550_v46  ;;  %v711_v34 = vmul.f32 0.587, %v2552_v24  ;;  %v713_v35 = vmul.f32 0.114, %v2554_v47  ;;  %v729_v25 = vstv %s2224_s17 }
 0x341   : > { %vm715_vm10 = vcmask 1041408   ;;  %v730_v0 = vmul.f32 %v2550_v46, %v729_v25  ;;  %v735_v48 = vmul.f32 %v2552_v24, %v729_v25  ;;  %v739_v49 = vmul.f32 %v2554_v47, %v729_v25 }
 0x342   : > { %v712_v36 = vadd.f32 %v711_v34, %v710_v53 }
 0x344   : > { %v714_v37 = vadd.f32 %v713_v35, %v712_v36 }
 0x346   : > { %v716_v38 = vsel %vm715_vm10, %v714_v37, 0.0 }
 0x347   : > { %717 = vadd.xlane.f32.xlu0 %v716_v38 }
 0x3d0   : > { %v718_v39 = vpop.xlane.xlu0 %717 }
 0x3d1   : > { %v719_v40 = vrot.slane %v718_v39, 4 }
 0x3d3   : > { %v720_v41 = vadd.f32 %v719_v40, %v718_v39 }
 0x3d5   : > { %v721_v42 = vrot.slane %v720_v41, 2 }
 0x3d7   : > { %v722_v43 = vadd.f32 %v721_v42, %v720_v41 }
 0x3d9   : > { %v723_v44 = vrot.slane %v722_v43, 1 }
 0x3db   : > { %v724_v45 = vadd.f32 %v723_v44, %v722_v43 }
 0x3dd   : > { %1145 = vpush %v724_v45 }
 0x40e   : > { %s1146_s4 = spop %1145 }
 0x40f   : > { %s726_s9 = smul.f32 0.00390625, %s1146_s4 }
 0x411   : > { %s728_s6 = smul.f32 %s727_s26, %s726_s9 }
 0x413   : > { %v731_v11 = vstv %s728_s6 }
 0x414   : > { %v732_v50 = vadd.f32 %v731_v11, %v730_v0  ;;  %v736_v51 = vadd.f32 %v735_v48, %v731_v11  ;;  %v740_v52 = vadd.f32 %v739_v49, %v731_v11 }
 0x416   : > { %v733_v54 = vmax.f32 %v732_v50, 0.0  ;;  %v737_v55 = vmax.f32 %v736_v51, 0.0  ;;  %v741_v56 = vmax.f32 %v740_v52, 0.0 }
 0x418   : > { %v734_v48 = vmin.f32 %v733_v54, 1.0   ;;  %v738_v0 = vmin.f32 %v737_v55, 1.0   ;;  %v742_v25 = vmin.f32 %v741_v56, 1.0  }
 0x419 PF: > { %v753_v57 = vmul.f32 %v2550_v46, %v2384_v13  ;;  %v756_v58 = vmul.f32 %v2552_v24, %v2384_v13  ;;  %v759_v59 = vmul.f32 %v2554_v47, %v2384_v13  ;;  %s1257_s10 = scalar_select %p1098_p12, 1, 0  ;;  %v2714_v24 = vmov 0   ;;  %v2028_v48 = vphi %v2026_v48, %v734_v48   ;;  %v2024_v0 = vphi %v2022_v0, %v738_v0   ;;  %v2020_v25 = vphi %v2018_v25, %v742_v25   ;;  %v2040_v48 = vphi %v2563_v48, %v2028_v48   ;;  %v2036_v0 = vphi %v2561_v0, %v2024_v0   ;;  %v2032_v25 = vphi %v2559_v25, %v2020_v25  }
 0x41a   : > { %s765_s16 = sld [smem:[#allocation3 + %s2229_s23]]  ;;  %v2716_v47 = vmov 0   ;;  %v2718_v8 = vmov 0  }
 0x41b   : > { %v754_v60 = vmax.f32 %v753_v57, 0.0  ;;  %v757_v61 = vmax.f32 %v756_v58, 0.0  ;;  %v760_v62 = vmax.f32 %v759_v59, 0.0  ;;  %v1258_v63 = vstv %s1257_s10 }
 0x41c   : > { %vm1259_vm11 = vcmp.ne.s32.totalorder %v1258_v63, 0 }
 0x41d   : > { %v755_v3 = vmin.f32 %v754_v60, 1.0  ;;  %v758_v4 = vmin.f32 %v757_v61, 1.0  ;;  %v761_v5 = vmin.f32 %v760_v62, 1.0 }
 0x41f   : > { %v2705_v6 = vsel %vm1259_vm11, %v755_v3, %v2040_v48  ;;  %v2707_v46 = vsel %vm1259_vm11, %v758_v4, %v2036_v0  ;;  %v2709_v7 = vsel %vm1259_vm11, %v761_v5, %v2032_v25 }
 0x420   : > { %p766_p9 = scmp.gt.s32.totalorder %s765_s16, 0  ;;  %p1106_p13 = scmp.lt.s32.totalorder %s765_s16, 3 }
 0x422   : > { %s2961_s16 = smov (!%p766_p9, %s765_s16), 0 }
 0x423   : > { %s2963_s16 = smov (!%p1106_p13, %s2961_s16), 3 }
 0x424   : > { %p1111_p1 = scmp.eq.s32.totalorder %s2963_s16, 0 }
 0x425   : > { %s1112_s23 = sadd.s32 (!%p1111_p1), 4294967295, %s2963_s16 }
 0x426   : > { %773 = sbr.rel (%p1111_p1) target bundleno = 1377 (0x561), region = 104  ;;  %p2723_p0 = scmp.ne.s32.totalorder (!%p1111_p1), %s1112_s23, 0 }
 0x427   : > { %p1113_p2 = scmp.eq.s32.totalorder (!%p1111_p1), %s1112_s23, 0 }
 0x42b   : > { %v2727_v9 = vmov 0   ;;  %v2729_v32 = vmov 0   ;;  %v2731_v10 = vmov 0   ;;  %778 = sbr.rel (%p1113_p2) target bundleno = 1155 (0x483), region = 108  ;;  %s880_s12 = ssub.f32 (!%p1113_p2), 1.0, %s2227_s1 }
 0x430   : > { %v784_v12 = vmax.f32 %v2705_v6, %v2707_v46  ;;  %v786_v14 = vmin.f32 %v2705_v6, %v2707_v46  ;;  %vm2086_vm15 = vmmov 1   ;;  %v827_v25 = vstv %s2232_s24  ;;  %s1114_s24 = sadd.s32 4294967294, %s2963_s16 }
 0x431   : > { %v881_v11 = vmul.f32 0.2989, %v2705_v6  ;;  %v882_v50 = vmul.f32 0.587, %v2707_v46  ;;  %v884_v56 = vmul.f32 0.114, %v2709_v7  ;;  %v886_v63 = vstv %s880_s12 }
 0x432   : > { %v2738_v15 = vmax.f32 %v784_v12, %v2709_v7  ;;  %v787_v16 = vmin.f32 %v786_v14, %v2709_v7  ;;  %v888_v3 = vstv %s2227_s1  ;;  %p2779_p3 = scmp.ne.s32.totalorder %s1114_s24, 0  ;;  %p2784_p6 = scmp.eq.s32.totalorder %s1114_s24, 0 }
 0x433   : > { %v883_v55 = vadd.f32 %v882_v50, %v881_v11  ;;  %v893_v47 = vmul.f32 %v2707_v46, %v888_v3  ;;  %v897_v10 = vmul.f32 %v2709_v7, %v888_v3  ;;  %v889_v12 = vmul.f32 %v2705_v6, %v888_v3 }
 0x434   : > { %vm788_vm12 = vcmp.eq.f32.partialorder %v2738_v15, %v787_v16  ;;  %v789_v17 = vsub.f32 %v2738_v15, %v787_v16  ;;  %vm804_vm13 = vcmp.eq.f32.partialorder %v2738_v15, %v2705_v6  ;;  %vm805_vm14 = vcmp.eq.f32.partialorder %v2738_v15, %v2707_v46  ;;  %s1270_s1 = scalar_select %p2779_p3, 1, 0 }
 0x435   : > { %vm2752_vm0 = vmxor %vm804_vm13, %vm2086_vm15  ;;  %v798_v23 = vsub.f32 %v2738_v15, %v2705_v6  ;;  %v800_v1 = vsub.f32 %v2738_v15, %v2707_v46  ;;  %v802_v2 = vsub.f32 %v2738_v15, %v2709_v7  ;;  %v790_v40 = vsel %vm788_vm12, 1.0, %v2738_v15  ;;  %s1283_s8 = scalar_select %p2784_p6, 1, 0 }
 0x436   : > { %v792_v18 = vsel %vm788_vm12, 1.0, %v789_v17  ;;  %vm807_vm1 = vmand %vm805_vm14, %vm2752_vm0  ;;  %v885_v61 = vadd.f32 %v884_v56, %v883_v55 }
 0x437   : > { %1674 = vrcp.f32 %v792_v18  ;;  %vm808_vm2 = vmxor %vm807_vm1, %vm2086_vm15 }
 0x438   : > { %vm809_vm3 = vmand %vm808_vm2, %vm2752_vm0  ;;  %1676 = vrcp.f32 %v790_v40  ;;  %v887_v24 = vmul.f32 %v886_v63, %v885_v61 }
 0x444   : > { %v1675_v19 = vpop.eup %1674 }
 0x445   : > { %v794_v20 = vmul.f32 %v1675_v19, %v792_v18  ;;  %v1677_v51 = vpop.eup %1676  ;;  %v894_v18 = vadd.f32 %v893_v47, %v887_v24 }
 0x446   : > { %v797_v57 = vmul.f32 %v1677_v51, %v789_v17 }
 0x447   : > { %v795_v22 = vsub.f32 2.0, %v794_v20 }
 0x448   : > { %v840_v60 = vsub.f32 1.0, %v797_v57 }
 0x449   : > { %v796_v26 = vmul.f32 %v1675_v19, %v795_v22  ;;  %v898_v22 = vadd.f32 %v897_v10, %v887_v24 }
 0x44a   : > { %v841_v5 = vmul.f32 %v840_v60, %v2738_v15 }
 0x44b   : > { %v799_v27 = vmul.f32 %v798_v23, %v796_v26  ;;  %v801_v28 = vmul.f32 %v800_v1, %v796_v26  ;;  %v803_v29 = vmul.f32 %v802_v2, %v796_v26  ;;  %v890_v23 = vadd.f32 %v889_v12, %v887_v24 }
 0x44c   : > { %v842_v14 = vmax.f32 %v841_v5, 0.0 }
 0x44d   : > { %v810_v30 = vsub.f32 %v803_v29, %v801_v28  ;;  %v812_v31 = vadd.f32 2.0, %v799_v27  ;;  %v816_v33 = vadd.f32 4.0, %v801_v28  ;;  %v895_v28 = vmax.f32 %v894_v18, 0.0 }
 0x44e   : > { %v843_v1 = vmin.f32 %v842_v14, 1.0 }
 0x44f   : > { %v811_v53 = vsel %vm804_vm13, %v810_v30, 0.0  ;;  %v813_v34 = vsub.f32 %v812_v31, %v803_v29  ;;  %v817_v35 = vsub.f32 %v816_v33, %v799_v27  ;;  %v1271_v27 = vstv %s1270_s1 }
 0x450   : > { %v1284_v29 = vstv %s1283_s8  ;;  %v899_v33 = vmax.f32 %v898_v22, 0.0  ;;  %vm1272_vm11 = vcmp.ne.s32.totalorder %v1271_v27, 0 }
 0x451   : > { %v814_v36 = vsel %vm807_vm1, %v813_v34, 0.0  ;;  %v818_v37 = vsel %vm809_vm3, %v817_v35, 0.0  ;;  %vm1285_vm13 = vcmp.ne.s32.totalorder %v1284_v29, 0 }
 0x452   : > { %v815_v38 = vadd.f32 %v814_v36, %v811_v53  ;;  %v891_v53 = vmax.f32 %v890_v23, 0.0 }
 0x454   : > { %v819_v39 = vadd.f32 %v818_v37, %v815_v38  ;;  %v892_v11 = vmin.f32 %v891_v53, 1.0 }
 0x456   : > { %v820_v41 = vmul.f32 0.16666667, %v819_v39  ;;  %v896_v39 = vmin.f32 %v895_v28, 1.0 }
 0x458   : > { %v821_v42 = vadd.f32 1.0, %v820_v41 }
 0x45a   : > { %v822_v43 = vfloor.f32 %v821_v42 }
 0x45c   : > { %v823_v44 = vsub.f32 %v821_v42, %v822_v43  ;;  %v900_v43 = vmin.f32 %v899_v33, 1.0 }
 0x45e   : > { %vm824_vm4 = vcmp.ge.f32.partialorder %v823_v44, 1.0  ;;  %v1116_v45 = vadd.f32 -1.0, %v823_v44 }
 0x460   : > { %v826_v0 = vsel %vm824_vm4, %v1116_v45, %v823_v44 }
 0x461   : > { %v828_v48 = vadd.f32 %v827_v25, %v826_v0 }
 0x463   : > { %v829_v49 = vfloor.f32 %v828_v48 }
 0x465   : > { %v830_v52 = vsub.f32 %v828_v48, %v829_v49 }
 0x467   : > { %vm831_vm5 = vcmp.ge.f32.partialorder %v830_v52, 1.0  ;;  %v1117_v54 = vadd.f32 -1.0, %v830_v52 }
 0x469   : > { %v833_v58 = vsel %vm831_vm5, %v1117_v54, %v830_v52 }
 0x46a   : > { %v834_v59 = vmul.f32 6.0, %v833_v58 }
 0x46c   : > { %v835_v62 = vfloor.f32 %v834_v59 }
 0x46e   : > { %v836_v4 = vsub.f32 %v834_v59, %v835_v62  ;;  %v1118_v8 = vadd.f32 -6.0, %v835_v62  ;;  %vm837_vm6 = vcmp.ge.f32.partialorder %v835_v62, 6.0 }
 0x470   : > { %v844_v9 = vmul.f32 %v836_v4, %v797_v57  ;;  %v849_v32 = vsub.f32 1.0, %v836_v4  ;;  %v839_v19 = vsel %vm837_vm6, %v1118_v8, %v835_v62 }
 0x471   : > { %vm858_vm7 = vcmp.eq.f32.partialorder %v839_v19, 3.0  ;;  %vm859_vm8 = vcmp.eq.f32.partialorder %v839_v19, 4.0  ;;  %vm857_vm9 = vcmp.eq.f32.partialorder %v839_v19, 2.0  ;;  %vm856_vm10 = vcmp.eq.f32.partialorder %v839_v19, 1.0 }
 0x472   : > { %v845_v16 = vsub.f32 1.0, %v844_v9  ;;  %v850_v17 = vmul.f32 %v849_v32, %v797_v57  ;;  %vm855_vm12 = vcmp.eq.f32.partialorder %v839_v19, 0.0 }
 0x474   : > { %v846_v20 = vmul.f32 %v845_v16, %v2738_v15  ;;  %v851_v21 = vsub.f32 1.0, %v850_v17 }
 0x476   : > { %v847_v2 = vmax.f32 %v846_v20, 0.0  ;;  %v852_v26 = vmul.f32 %v851_v21, %v2738_v15 }
 0x478   : > { %v848_v30 = vmin.f32 %v847_v2, 1.0  ;;  %v853_v31 = vmax.f32 %v852_v26, 0.0 }
 0x47a   : > { %v854_v34 = vmin.f32 %v853_v31, 1.0  ;;  %v865_v35 = vsel %vm858_vm7, %v848_v30, %v843_v1  ;;  %v869_v36 = vsel %vm859_vm8, %v2738_v15, %v848_v30 }
 0x47b   : > { %v866_v37 = vsel %vm857_vm9, %v2738_v15, %v865_v35  ;;  %v870_v38 = vsel %vm858_vm7, %v2738_v15, %v869_v36 }
 0x47c   : > { %v860_v40 = vsel %vm859_vm8, %v854_v34, %v2738_v15  ;;  %v867_v41 = vsel %vm856_vm10, %v2738_v15, %v866_v37  ;;  %v871_v42 = vsel %vm857_vm9, %v854_v34, %v870_v38 }
 0x47d   : > { %v861_v44 = vsel %vm858_vm7, %v843_v1, %v860_v40  ;;  %v868_v45 = vsel %vm855_vm12, %v854_v34, %v867_v41  ;;  %v872_v25 = vsel %vm856_vm10, %v843_v1, %v871_v42 }
 0x47e   : > { %v862_v0 = vsel %vm857_vm9, %v843_v1, %v861_v44  ;;  %v873_v48 = vsel %vm855_vm12, %v843_v1, %v872_v25  ;;  %v1277_v49 = vsel %vm1272_vm11, %v868_v45, 0 }
 0x47f   : > { %v863_v50 = vsel %vm856_vm10, %v848_v30, %v862_v0  ;;  %v1281_v51 = vsel %vm1272_vm11, %v873_v48, 0  ;;  %v1290_v32 = vsel %vm1285_vm13, %v896_v39, %v1277_v49  }
 0x480   : > { %v864_v52 = vsel %vm855_vm12, %v2738_v15, %v863_v50  ;;  %v1294_v9 = vsel %vm1285_vm13, %v900_v43, %v1281_v51  }
 0x481   : > { %v1273_v54 = vsel %vm1272_vm11, %v864_v52, 0 }
 0x482   : > { %v1286_v10 = vsel %vm1285_vm13, %v892_v11, %v1273_v54  }
 0x483 PF: > { %v2054_v24 = vmov %v2044_v9   ;;  %v2058_v47 = vmov %v2048_v32   ;;  %v2062_v8 = vmov %v2052_v10   ;;  %909 = sbr.rel (%p2723_p0) target bundleno = 1377 (0x561), region = 120  ;;  %s927_s11 = ssub.f32 (!%p2723_p0), 1.0, %s2224_s17  ;;  %v2052_v10 = vphi %v2731_v10, %v1286_v10   ;;  %v2048_v32 = vphi %v2729_v32, %v1290_v32   ;;  %v2044_v9 = vphi %v2727_v9, %v1294_v9  }
 0x488   : > { %v910_v15 = vmul.f32 0.2989, %v2705_v6  ;;  %v911_v55 = vmul.f32 0.587, %v2707_v46  ;;  %v913_v56 = vmul.f32 0.114, %v2709_v7  ;;  %v929_v24 = vstv %s2224_s17 }
 0x489   : > { %vm915_vm14 = vcmask 1041408   ;;  %v930_v47 = vmul.f32 %v2705_v6, %v929_v24  ;;  %v935_v8 = vmul.f32 %v2707_v46, %v929_v24  ;;  %v939_v9 = vmul.f32 %v2709_v7, %v929_v24 }
 0x48a   : > { %v912_v57 = vadd.f32 %v911_v55, %v910_v15 }
 0x48c   : > { %v914_v58 = vadd.f32 %v913_v56, %v912_v57 }
 0x48e   : > { %v916_v59 = vsel %vm915_vm14, %v914_v58, 0.0 }
 0x48f   : > { %917 = vadd.xlane.f32.xlu0 %v916_v59 }
 0x518   : > { %v918_v60 = vpop.xlane.xlu0 %917 }
 0x519   : > { %v919_v61 = vrot.slane %v918_v60, 4 }
 0x51b   : > { %v920_v62 = vadd.f32 %v919_v61, %v918_v60 }
 0x51d   : > { %v921_v63 = vrot.slane %v920_v62, 2 }
 0x51f   : > { %v922_v3 = vadd.f32 %v921_v63, %v920_v62 }
 0x521   : > { %v923_v4 = vrot.slane %v922_v3, 1 }
 0x523   : > { %v924_v5 = vadd.f32 %v923_v4, %v922_v3 }
 0x525   : > { %1147 = vpush %v924_v5 }
 0x556   : > { %s1148_s13 = spop %1147 }
 0x557   : > { %s926_s14 = smul.f32 0.00390625, %s1148_s13 }
 0x559   : > { %s928_s26 = smul.f32 %s927_s11, %s926_s14 }
 0x55b   : > { %v931_v32 = vstv %s928_s26 }
 0x55c   : > { %v932_v10 = vadd.f32 %v931_v32, %v930_v47  ;;  %v936_v12 = vadd.f32 %v935_v8, %v931_v32  ;;  %v940_v14 = vadd.f32 %v939_v9, %v931_v32 }
 0x55e   : > { %v933_v16 = vmax.f32 %v932_v10, 0.0  ;;  %v937_v17 = vmax.f32 %v936_v12, 0.0  ;;  %v941_v18 = vmax.f32 %v940_v14, 0.0 }
 0x560   : > { %v934_v8 = vmin.f32 %v933_v16, 1.0   ;;  %v938_v47 = vmin.f32 %v937_v17, 1.0   ;;  %v942_v24 = vmin.f32 %v941_v18, 1.0  }
 0x561 PF: > { %v953_v19 = vmul.f32 %v2705_v6, %v2384_v13  ;;  %s1296_s17 = scalar_select %p1111_p1, 1, 0  ;;  %v956_v20 = vmul.f32 %v2707_v46, %v2384_v13  ;;  %v959_v21 = vmul.f32 %v2709_v7, %v2384_v13  ;;  %v2064_v8 = vphi %v2062_v8, %v934_v8   ;;  %v2060_v47 = vphi %v2058_v47, %v938_v47   ;;  %v2056_v24 = vphi %v2054_v24, %v942_v24   ;;  %v2076_v8 = vphi %v2718_v8, %v2064_v8   ;;  %v2072_v47 = vphi %v2716_v47, %v2060_v47   ;;  %v2068_v24 = vphi %v2714_v24, %v2056_v24  }
 0x562   : > { %s1149_s4 = smul.u32 96, %s2137_s0  ;;  %s984_s9 = sshll.u32 %s2243_s30, 4  ;;  %s2866_s9 = int_to_ptr.vmem [resolvable:$true] %s984_s9 }
 0x563   : > { %v954_v22 = vmax.f32 %v953_v19, 0.0  ;;  %v1297_v23 = vstv %s1296_s17  ;;  %v957_v1 = vmax.f32 %v956_v20, 0.0  ;;  %v960_v2 = vmax.f32 %v959_v21, 0.0  ;;  %s971_s0 = scalar_lea.sflag [#allocation7], %s2206_s5  ;;  %s1722_s23 = scalar_lea.vmem %s2866_s9, 96 }
 0x564   : > { %vm1298_vm15 = vcmp.ne.s32.totalorder %v1297_v23, 0  ;;  %s2864_s16 = scalar_lea.hbm %s2913_s3, %s1149_s4  ;;  %p1723_p10 = scmp.ne.s32.totalorder %s2866_s9, %s1722_s23 }
 0x565   : > { %v955_v6 = vmin.f32 %v954_v22, 1.0  ;;  %v958_v26 = vmin.f32 %v957_v1, 1.0  ;;  %v961_v27 = vmin.f32 %v960_v2, 1.0  ;;  %p2942_p11 = scmp.ne.s32.totalorder %s2918_s27, 0  ;;  %s2087_s15 = smov [#allocation8]  }
 0x566   : > { %s1726_s12 = sshll.u32 %s2087_s15, 4  ;;  %s1727_s12 = int_to_ptr.vmem [resolvable:$false] %s1726_s12 }
 0x567   : > { %v1299_v13 = vsel %vm1298_vm15, %v955_v6, %v2076_v8  ;;  %v1303_v46 = vsel %vm1298_vm15, %v958_v26, %v2072_v47  ;;  %v1307_v7 = vsel %vm1298_vm15, %v961_v27, %v2068_v24  ;;  %p1724_p12 = pnand %p1723_p10, %p2942_p11  ;;  %s1728_s24 = scalar_lea.vmem %s1727_s12, 192 }
 0x568   : > { %965 = vst [vmem:[%s2243_s30] sm:$0x3] %v1299_v13  ;;  %1119 = vst [vmem:[%s2243_s30 + $0x2] sm:$0x3] %v1303_v46  ;;  %p1729_p5 = scmp.lt.s32.totalorder %s2866_s9, %s1727_s12  ;;  %p1730_p7 = scmp.lt.s32.totalorder %s1728_s24, %s1722_s23 }
 0x569   : > { %1120 = vst [vmem:[%s2243_s30 + $0x4] sm:$0x3] %v1307_v7  ;;  %p1725_p4 = pneg %p1724_p12 }
 0x56a   : > { %p1731_p8 = por %p1730_p7, %p1729_p5 }
 0x56c   : > { %p1732_p9 = pnand %p1731_p8, %p1725_p4 }
 0x56e   : > { %1735 = shalt.err (!%p1732_p9)
}
 0x56f   : > { %s1736_s30 = scalar_lea.hbm %s2864_s16, 96  ;;  %s1740_s1 = scalar_lea.hbm %s2913_s3, 384 }
 0x570   : > { %p1737_p13 = scmp.ne.s32.totalorder %s2864_s16, %s1736_s30  ;;  %p1741_p2 = scmp.lt.s32.totalorder %s2864_s16, %s2913_s3 }
 0x571   : > { %p1742_p3 = scmp.lt.s32.totalorder %s1740_s1, %s1736_s30 }
 0x572   : > { %p1738_p1 = pnand %p1737_p13, %p2942_p11 }
 0x573   : > { %p1743_p6 = por %p1742_p3, %p1741_p2 }
 0x574   : > { %p1739_p0 = pneg %p1738_p1 }
 0x576   : > { %p1744_p10 = pnand %p1743_p6, %p1739_p0 }
 0x578   : > { %1747 = shalt.err (!%p1744_p10)
}
 0x579   : > { %s2088_s13 = smov 32   ;;  %s2089_s14 = smov 2  }
 0x57a   : > { %1308 = dma.vmem_to_hbm [thread:$0]  (%p2942_p11), %s2866_s9, 96, %s2864_s16, %s971_s0, %s2088_s13, %s2088_s13, %s2089_s14  }
 0x57b PF: > { %p1331_p12 = scmp.ge.s32.totalorder %s1932_s21, 2  ;;  %s999_s26 = sand.u32 1, %s1920_s18  }
 0x57c   : > { %p2943_p4 = scmp.ne.s32.totalorder %s2919_s28, 0  ;;  %s1000_s17 = scalar_lea.sflag [#allocation7], %s999_s26 }
 0x57e   : > { %p1315_p5 = pnand %p1331_p12, %p2943_p4 }
 0x580   : > { %p1316_p7 = pneg %p1315_p5 }
 0x582   : > { %1915 = dma.done.wait (%p1316_p7), %s1000_s17, 96  }
 0x583   : > { %1917 = vsyncadd (%p1316_p7), %s1000_s17, 4294967200  ;;  %p22_p8 = scmp.ge.s32.totalorder %s2141_s22, 6   ;;  %s2944_s18 = smov %s1924_s19 }
 0x584   : > { %s2945_s19 = smov %s1928_s20  ;;  %s2946_s20 = smov %s2153_s25 }
 0x585   : > { %s2947_s21 = smov %s2141_s22  ;;  %24 = sbr.rel (!%p22_p8) target bundleno = 11 (0xb), region = 169 }
 0x58a   :  { %1005 = vsyncpa [#allocation6], 1 }
 0x58b   :  { %1007 = vsyncpa [#allocation6 + $0x1], 1 }
 0x58c   :  { %1008 = vsyncpa [#allocation7], 1 }
 0x58d   :  { %1010 = vsyncpa [#allocation7 + $0x1], 1 }

</bundles_post_ra>
